<compile_context>
chip_gen: v7x
topology: tpu7x:2x2x1
jax: 0.10.0
libtpu: 0.0.40
codegen_flags: <defaults>
</compile_context>

<pallas_src>
import math

import jax
import jax.numpy as jnp
from jax import lax
from jax.experimental import pallas as pl
from jax.experimental.pallas import tpu as pltpu


# ----------------------------------------------------------------------------
# small helpers
# ----------------------------------------------------------------------------
def _layer_norm(x, gamma, beta, eps):
    # x: (T, H) f32, gamma/beta: (1, H) f32 — statistics kept in f32.
    mean = jnp.mean(x, axis=-1, keepdims=True)
    var = jnp.mean((x - mean) ** 2, axis=-1, keepdims=True)
    inv = lax.rsqrt(var + eps)
    return (x - mean) * inv * gamma + beta


def _gelu_exact(x):
    # PyTorch nn.GELU / HF "gelu" default: exact erf-based GELU (f32).
    return 0.5 * x * (1.0 + lax.erf(x * (1.0 / math.sqrt(2.0))))


def _pick_tile(n, candidates):
    for t in candidates:
        if n % t == 0:
            return t
    return n


def _vmem_capacity_bytes():
    try:
        return int(pltpu.get_tpu_info().vmem_capacity_bytes)
    except Exception:
        return 128 * 1024 * 1024   # assume a 128 MiB part if the query fails


# ----------------------------------------------------------------------------
# kernel
# ----------------------------------------------------------------------------
def _make_kernel(num_heads, head_dim, eps, q_tile, kv_tile, num_kv_tiles,
                 num_i_tiles):
    scale = 1.0 / math.sqrt(head_dim)

    def kernel(x_ref,
               wq_ref, bq_ref, wk_ref, bk_ref, wv_ref, bv_ref,
               wo_ref, bo_ref, g1_ref, be1_ref,
               wi_ref, bi_ref, wo2_ref, bo2_ref, g2_ref, be2_ref,
               out_ref, k_scr, v_scr):
        qi = pl.program_id(1)
        hidden = x_ref.shape[-1]

        # ---- K/V projections: computed once per batch element --------------
        # The qi axis revisits the same (b, 0, 0) input block, and is marked
        # "arbitrary", so caching into persistent VMEM scratch is safe.
        @pl.when(qi == 0)
        def _():
            x_bf = x_ref[0].astype(jnp.bfloat16)                 # (S, H)

            def kv_body(h, carry):
                k_h = jnp.dot(x_bf, wk_ref[h],
                              preferred_element_type=jnp.float32) + bk_ref[h]
                v_h = jnp.dot(x_bf, wv_ref[h],
                              preferred_element_type=jnp.float32) + bv_ref[h]
                k_scr[h] = k_h.astype(jnp.bfloat16)              # (S, hd)
                v_scr[h] = v_h.astype(jnp.bfloat16)
                return carry

            lax.fori_loop(0, num_heads, kv_body, 0)

        # ---- query / residual tile sliced from the resident (S, H) block ---
        q_start = pl.multiple_of(qi * q_tile, q_tile)
        xq = x_ref[0, pl.ds(q_start, q_tile), :]                 # (TQ, H) f32
        xq_bf = xq.astype(jnp.bfloat16)

        # ---- multi-head attention -------------------------------------------
        # fori_loop over heads; flash-style online softmax over K/V tiles;
        # per-head context feeds its slice of the output projection directly
        # into a lane-dense (TQ, H) f32 accumulator.
        def head_body(h, attn_acc):
            q_h = (jnp.dot(xq_bf, wq_ref[h],
                           preferred_element_type=jnp.float32)
                   + bq_ref[h]) * scale                          # scale folded here
            q_h = q_h.astype(jnp.bfloat16)                       # (TQ, hd)

            def kv_step(t, carry):
                m_prev, l_prev, acc_prev = carry
                ks = pl.multiple_of(t * kv_tile, kv_tile)
                k_t = k_scr[h, pl.ds(ks, kv_tile), :]            # (TK, hd) bf16
                v_t = v_scr[h, pl.ds(ks, kv_tile), :]
                s = lax.dot_general(q_h, k_t, (((1,), (1,)), ((), ())),
                                    preferred_element_type=jnp.float32)  # (TQ, TK)
                m_new = jnp.maximum(m_prev, jnp.max(s, axis=-1, keepdims=True))
                alpha = jnp.exp(m_prev - m_new)
                p = jnp.exp(s - m_new)
                l_new = alpha * l_prev + jnp.sum(p, axis=-1, keepdims=True)
                acc_new = alpha * acc_prev + jnp.dot(
                    p.astype(jnp.bfloat16), v_t,
                    preferred_element_type=jnp.float32)
                return m_new, l_new, acc_new

            m0 = jnp.full((q_tile, 1), -jnp.inf, jnp.float32)
            l0 = jnp.zeros((q_tile, 1), jnp.float32)
            a0 = jnp.zeros((q_tile, head_dim), jnp.float32)
            _, l_f, acc_f = lax.fori_loop(0, num_kv_tiles, kv_step,
                                          (m0, l0, a0))
            ctx_h = acc_f * pl.reciprocal(l_f, approx=True)      # (TQ, hd) f32
            return attn_acc + jnp.dot(ctx_h.astype(jnp.bfloat16), wo_ref[h],
                                      preferred_element_type=jnp.float32)

        attn_proj = lax.fori_loop(
            0, num_heads, head_body,
            jnp.zeros((q_tile, hidden), jnp.float32)) + bo_ref[...]

        # ---- BertSelfOutput: residual + LayerNorm ---------------------------
        attn_out = _layer_norm(attn_proj + xq, g1_ref[...], be1_ref[...], eps)
        attn_out_bf = attn_out.astype(jnp.bfloat16)

        # ---- feed_forward_chunk: Intermediate (GELU) + Output ---------------
        # Compute-chunked over the intermediate dim: exact (GELU per chunk,
        # then sum of partial (TQ, H) products), bounds the f32 temporary.
        def ffn_body(c, ffn_acc):
            inter = _gelu_exact(
                jnp.dot(attn_out_bf, wi_ref[c],
                        preferred_element_type=jnp.float32) + bi_ref[c])
            return ffn_acc + jnp.dot(inter.astype(jnp.bfloat16), wo2_ref[c],
                                     preferred_element_type=jnp.float32)

        ffn = lax.fori_loop(0, num_i_tiles, ffn_body,
                            jnp.zeros((q_tile, hidden), jnp.float32)) + bo2_ref[...]

        layer_out = _layer_norm(ffn + attn_out, g2_ref[...], be2_ref[...], eps)
        out_ref[0] = layer_out.astype(out_ref.dtype)

    return kernel


# ----------------------------------------------------------------------------
# wrapper
# ----------------------------------------------------------------------------
def model_layer_forward(x, params, *, num_heads, eps=1e-12,
                        q_tile=None, kv_tile=None, i_tile=None):
    """x: (B, S, H) float32.  Returns (B, S, H) float32."""
    B, S, H = x.shape
    assert H % num_heads == 0
    hd = H // num_heads
    I = params["wi"].shape[1]

    vmem_cap = _vmem_capacity_bytes()
    small_vmem = vmem_cap < 96 * 1024 * 1024            # v7x-class 64 MiB part
    TQ = q_tile if q_tile is not None else _pick_tile(
        S, (256, 128) if small_vmem else (512, 256, 128))
    TK = kv_tile if kv_tile is not None else _pick_tile(
        S, (256, 128) if small_vmem else (512, 256, 128))
    TI = i_tile if i_tile is not None else _pick_tile(
        I, (2048, 1024, 512, 256, 128))
    assert S % TQ == 0 and S % TK == 0 and I % TI == 0
    nq, nkv, nI = S // TQ, S // TK, I // TI
    # TODO(synk): when B == 1 only one parallel grid unit exists, so one v7x
    # TensorCore idles; a per-core K/V recompute scheme could split q-tiles too.

    kernel = _make_kernel(num_heads, hd, eps, TQ, TK, nkv, nI)

    bf16 = jnp.bfloat16

    # Head-major / chunk-major weight layouts so all dynamic indexing in the
    # kernel is on leading dims (no dynamic lane slicing, no masked stores).
    def split_w(w):   # (H, H) -> (num_heads, H, hd)   (columns split per head)
        return w.reshape(H, num_heads, hd).transpose(1, 0, 2)

    def split_b(b):   # (1, H) -> (num_heads, 1, hd)
        return b.reshape(1, num_heads, hd).transpose(1, 0, 2)

    param_vals = [
        split_w(params["wq"]).astype(bf16), split_b(params["bq"]),
        split_w(params["wk"]).astype(bf16), split_b(params["bk"]),
        split_w(params["wv"]).astype(bf16), split_b(params["bv"]),
        params["wo"].reshape(num_heads, hd, H).astype(bf16),
        params["bo"], params["g1"], params["be1"],
        params["wi"].reshape(H, nI, TI).transpose(1, 0, 2).astype(bf16),
        params["bi"].reshape(1, nI, TI).transpose(1, 0, 2),
        params["wo2"].reshape(nI, TI, H).astype(bf16),
        params["bo2"], params["g2"], params["be2"],
    ]

    def _nbytes(a):
        return int(a.size) * a.dtype.itemsize
    param_bytes = sum(_nbytes(p) for p in param_vals)

    # Advisory cost estimate so XLA schedules the custom call sensibly.
    flops = 2 * B * S * (4 * H * H + 2 * S * H + 2 * H * I)
    transcendentals = B * num_heads * S * S + B * S * I
    bytes_accessed = 2 * B * S * H * 4 + param_bytes
    cost = pl.CostEstimate(flops=flops, transcendentals=transcendentals,
                           bytes_accessed=bytes_accessed)

    def _const_index_map(ndim):
        def im(b, qi):
            return (0,) * ndim
        return im

    def _build_and_call(single_buffer_weights):
        def param_spec(p):
            kwargs = {}
            if single_buffer_weights:
                # Grid-invariant weights: double buffering buys nothing,
                # single-buffer them to halve weight VMEM residency.
                kwargs["pipeline_mode"] = pl.Buffered(1)
            return pl.BlockSpec(p.shape, _const_index_map(p.ndim), **kwargs)

        in_specs = [pl.BlockSpec((1, S, H), lambda b, qi: (b, 0, 0))] + \
                   [param_spec(p) for p in param_vals]

        # Honest VMEM residency estimate: weights (x buffer count), pipelined
        # x/out blocks, K/V scratch slabs, and compute temporaries (scores,
        # f32 accumulators, bf16 casts, FFN chunk), with 1.5x headroom,
        # capped at ~75% of physical VMEM (>= 64 MiB allowed on 128 MiB parts).
        wbuf = 1 if single_buffer_weights else 2
        resident = (wbuf * param_bytes
                    + 2 * S * H * 4                 # double-buffered x block
                    + 2 * TQ * H * 4                # double-buffered out block
                    + 2 * S * H * 2                 # bf16 K/V scratch slabs
                    + 4 * (3 * TQ * TK + 8 * TQ * H + 2 * TQ * TI + S * H))
        vmem_limit = int(min(int(0.75 * vmem_cap),
                             max(16 * 1024 * 1024, int(1.5 * resident))))

        return pl.pallas_call(
            kernel,
            out_shape=jax.ShapeDtypeStruct((B, S, H), x.dtype),
            grid_spec=pltpu.PrefetchScalarGridSpec(
                num_scalar_prefetch=0,
                grid=(B, nq),
                in_specs=in_specs,
                out_specs=pl.BlockSpec((1, TQ, H), lambda b, qi: (b, qi, 0)),
                scratch_shapes=[pltpu.VMEM((num_heads, S, hd), bf16),   # K cache
                                pltpu.VMEM((num_heads, S, hd), bf16)],  # V cache
            ),
            compiler_params=pltpu.CompilerParams(
                # qi reuses the K/V scratch cached at qi==0, so it must stay
                # "arbitrary"; batch stays "parallel" for megacore sharding.
                dimension_semantics=("parallel", "arbitrary"),
                vmem_limit_bytes=vmem_limit,
            ),
            cost_estimate=cost,
        )(x, *param_vals)

    try:
        return _build_and_call(True)
    except Exception:
        # Fallback if this JAX build rejects pl.Buffered(1) single-buffering
        # (default double-buffered weights; everything else identical).
        return _build_and_call(False)


# ----------------------------------------------------------------------------
# params + pure-JAX reference (tolerance-checked, per review)
# ----------------------------------------------------------------------------
def init_params(key, hidden, intermediate):
    ks = jax.random.split(key, 8)
    std = 0.02

    def w(k, shape):
        return (std * jax.random.normal(k, shape)).astype(jnp.float32)

    H, I = hidden, intermediate
    return {
        # SelfAttention
        "wq": w(ks[0], (H, H)), "bq": jnp.zeros((1, H), jnp.float32),
        "wk": w(ks[1], (H, H)), "bk": jnp.zeros((1, H), jnp.float32),
        "wv": w(ks[2], (H, H)), "bv": jnp.zeros((1, H), jnp.float32),
        # BertSelfOutput
        "wo": w(ks[3], (H, H)), "bo": jnp.zeros((1, H), jnp.float32),
        "g1": jnp.ones((1, H), jnp.float32), "be1": jnp.zeros((1, H), jnp.float32),
        # Intermediate
        "wi": w(ks[4], (H, I)), "bi": jnp.zeros((1, I), jnp.float32),
        # Output
        "wo2": w(ks[5], (I, H)), "bo2": jnp.zeros((1, H), jnp.float32),
        "g2": jnp.ones((1, H), jnp.float32), "be2": jnp.zeros((1, H), jnp.float32),
    }


def model_layer_reference(x, params, *, num_heads, eps=1e-12):
    B, S, H = x.shape
    hd = H // num_heads

    def ln(t, g, b):
        m = t.mean(-1, keepdims=True)
        v = ((t - m) ** 2).mean(-1, keepdims=True)
        return (t - m) * lax.rsqrt(v + eps) * g + b

    q = x @ params["wq"] + params["bq"]
    k = x @ params["wk"] + params["bk"]
    v = x @ params["wv"] + params["bv"]

    def split(t):
        return t.reshape(B, S, num_heads, hd).transpose(0, 2, 1, 3)

    qh, kh, vh = split(q), split(k), split(v)
    scores = jnp.einsum("bhqd,bhkd->bhqk", qh, kh) / math.sqrt(hd)
    p = jax.nn.softmax(scores, axis=-1)
    ctx = jnp.einsum("bhqk,bhkd->bhqd", p, vh).transpose(0, 2, 1, 3).reshape(B, S, H)
    attn = ctx @ params["wo"] + params["bo"]
    attn_out = ln(attn + x, params["g1"], params["be1"])

    h1 = attn_out @ params["wi"] + params["bi"]
    inter = 0.5 * h1 * (1.0 + lax.erf(h1 / math.sqrt(2.0)))
    ffn = inter @ params["wo2"] + params["bo2"]
    return ln(ffn + attn_out, params["g2"], params["be2"])


# TODO(synk): 'fourier', 'lmu', 'sgu' attention variants, tiny_attention,
# decoder / cross-attention paths are alternate config branches and are not
# implemented here; only the default self-attention encoder path is kernelized.
# TODO(synk): true HBM streaming of wi/wo2 tiles (BlockSpec over a grid axis)
# for configs whose weights exceed v7x VMEM even with single buffering.

if __name__ == "__main__":
    B, S, H, NUM_HEADS, INTER = 2, 8, 32, 2, 64

    key = jax.random.PRNGKey(0)
    k_x, k_p = jax.random.split(key)
    x = jax.random.normal(k_x, (B, S, H), dtype=jnp.float32)
    params = init_params(k_p, H, INTER)

    out = model_layer_forward(x, params, num_heads=NUM_HEADS)
    out = jax.block_until_ready(out)
    assert out.shape == (B, S, H) and out.dtype == jnp.float32
    assert bool(jnp.all(jnp.isfinite(out)))

    # tolerance-checked pure-JAX reference (bf16 MXU + approx reciprocal)
    ref = model_layer_reference(x, params, num_heads=NUM_HEADS)
    max_err = float(jnp.max(jnp.abs(out - ref)))
    assert max_err < 5e-2, f"max abs error vs reference: {max_err}"

    print("KERNEL_OK")
</pallas_src>

<mosaic_0001>
module attributes {stable_mosaic.version = 11 : i64} {
  func.func @kernel(%arg0: i32, %arg1: i32, %arg2: memref<1x8x32xf32, #tpu.memory_space<vmem>>, %arg3: memref<2x32x16xbf16, #tpu.memory_space<vmem>>, %arg4: memref<2x1x16xf32, #tpu.memory_space<vmem>>, %arg5: memref<2x32x16xbf16, #tpu.memory_space<vmem>>, %arg6: memref<2x1x16xf32, #tpu.memory_space<vmem>>, %arg7: memref<2x32x16xbf16, #tpu.memory_space<vmem>>, %arg8: memref<2x1x16xf32, #tpu.memory_space<vmem>>, %arg9: memref<2x16x32xbf16, #tpu.memory_space<vmem>>, %arg10: memref<1x32xf32, #tpu.memory_space<vmem>>, %arg11: memref<1x32xf32, #tpu.memory_space<vmem>>, %arg12: memref<1x32xf32, #tpu.memory_space<vmem>>, %arg13: memref<1x32x64xbf16, #tpu.memory_space<vmem>>, %arg14: memref<1x1x64xf32, #tpu.memory_space<vmem>>, %arg15: memref<1x64x32xbf16, #tpu.memory_space<vmem>>, %arg16: memref<1x32xf32, #tpu.memory_space<vmem>>, %arg17: memref<1x32xf32, #tpu.memory_space<vmem>>, %arg18: memref<1x32xf32, #tpu.memory_space<vmem>>, %arg19: memref<1x8x32xf32, #tpu.memory_space<vmem>>, %arg20: memref<2x8x16xbf16, #tpu.memory_space<vmem>>, %arg21: memref<2x8x16xbf16, #tpu.memory_space<vmem>>) attributes {dimension_semantics = [#tpu.dimension_semantics<parallel>, #tpu.dimension_semantics<arbitrary>], iteration_bounds = array<i64: 2, 1>, scalar_prefetch = 0 : i64, scratch_operands = 2 : i64, tpu.core_type = #tpu.core_type<tc>, window_params = [{transform_indices = @transform_0, window_bounds = array<i64: 1, 8, 32>}, {pipeline_mode = #tpu.pipeline_mode<synchronous>, transform_indices = @transform_1, window_bounds = array<i64: 2, 32, 16>}, {pipeline_mode = #tpu.pipeline_mode<synchronous>, transform_indices = @transform_2, window_bounds = array<i64: 2, 1, 16>}, {pipeline_mode = #tpu.pipeline_mode<synchronous>, transform_indices = @transform_3, window_bounds = array<i64: 2, 32, 16>}, {pipeline_mode = #tpu.pipeline_mode<synchronous>, transform_indices = @transform_4, window_bounds = array<i64: 2, 1, 16>}, {pipeline_mode = #tpu.pipeline_mode<synchronous>, transform_indices = @transform_5, window_bounds = array<i64: 2, 32, 16>}, {pipeline_mode = #tpu.pipeline_mode<synchronous>, transform_indices = @transform_6, window_bounds = array<i64: 2, 1, 16>}, {pipeline_mode = #tpu.pipeline_mode<synchronous>, transform_indices = @transform_7, window_bounds = array<i64: 2, 16, 32>}, {pipeline_mode = #tpu.pipeline_mode<synchronous>, transform_indices = @transform_8, window_bounds = array<i64: 1, 32>}, {pipeline_mode = #tpu.pipeline_mode<synchronous>, transform_indices = @transform_9, window_bounds = array<i64: 1, 32>}, {pipeline_mode = #tpu.pipeline_mode<synchronous>, transform_indices = @transform_10, window_bounds = array<i64: 1, 32>}, {pipeline_mode = #tpu.pipeline_mode<synchronous>, transform_indices = @transform_11, window_bounds = array<i64: 1, 32, 64>}, {pipeline_mode = #tpu.pipeline_mode<synchronous>, transform_indices = @transform_12, window_bounds = array<i64: 1, 1, 64>}, {pipeline_mode = #tpu.pipeline_mode<synchronous>, transform_indices = @transform_13, window_bounds = array<i64: 1, 64, 32>}, {pipeline_mode = #tpu.pipeline_mode<synchronous>, transform_indices = @transform_14, window_bounds = array<i64: 1, 32>}, {pipeline_mode = #tpu.pipeline_mode<synchronous>, transform_indices = @transform_15, window_bounds = array<i64: 1, 32>}, {pipeline_mode = #tpu.pipeline_mode<synchronous>, transform_indices = @transform_16, window_bounds = array<i64: 1, 32>}, {transform_indices = @transform_17, window_bounds = array<i64: 1, 8, 32>}]} {
    %c0_i32 = arith.constant 0 : i32
    %0 = arith.cmpi eq, %arg1, %c0_i32 : i32
    %1 = arith.extui %0 : i1 to i32
    %c0_i32_0 = arith.constant 0 : i32
    %2 = arith.cmpi ne, %1, %c0_i32_0 : i32
    scf.if %2 {
      %c0_43 = arith.constant 0 : index
      %c0_44 = arith.constant 0 : index
      %c0_45 = arith.constant 0 : index
      %96 = vector.load %arg2[%c0_43, %c0_44, %c0_45] : memref<1x8x32xf32, #tpu.memory_space<vmem>>, vector<1x8x32xf32>
      %97 = vector.shape_cast %96 : vector<1x8x32xf32> to vector<8x32xf32>
      %98 = arith.truncf %97 : vector<8x32xf32> to vector<8x32xbf16>
      %c0_i32_46 = arith.constant 0 : i32
      %c2_i32_47 = arith.constant 2 : i32
      %99 = arith.addi %c0_i32_46, %c2_i32_47 : i32
      %c1_i32_48 = arith.constant 1 : i32
      scf.for %arg22 = %c0_i32_46 to %99 step %c1_i32_48  : i32 {
        %100 = arith.index_cast %arg22 : i32 to index
        %c0_50 = arith.constant 0 : index
        %c0_51 = arith.constant 0 : index
        %101 = vector.load %arg5[%100, %c0_50, %c0_51] : memref<2x32x16xbf16, #tpu.memory_space<vmem>>, vector<1x32x16xbf16>
        %102 = vector.shape_cast %101 : vector<1x32x16xbf16> to vector<32x16xbf16>
        %cst_52 = arith.constant dense<0.000000e+00> : vector<8x16xf32>
        %103 = tpu.matmul %98, %102, %cst_52 {dimension_numbers = #tpu.dot_dimension_numbers<[1], [0], [0], [1], [0, 0, 1, 1], [], []>} : vector<8x32xbf16>, vector<32x16xbf16>, vector<8x16xf32> -> vector<8x16xf32>
        %104 = arith.index_cast %arg22 : i32 to index
        %c0_53 = arith.constant 0 : index
        %c0_54 = arith.constant 0 : index
        %105 = vector.load %arg6[%104, %c0_53, %c0_54] : memref<2x1x16xf32, #tpu.memory_space<vmem>>, vector<1x1x16xf32>
        %106 = vector.shape_cast %105 : vector<1x1x16xf32> to vector<1x16xf32>
        %107 = vector.broadcast %106 : vector<1x16xf32> to vector<8x16xf32>
        %108 = arith.addf %103, %107 : vector<8x16xf32>
        %109 = arith.index_cast %arg22 : i32 to index
        %c0_55 = arith.constant 0 : index
        %c0_56 = arith.constant 0 : index
        %110 = vector.load %arg7[%109, %c0_55, %c0_56] : memref<2x32x16xbf16, #tpu.memory_space<vmem>>, vector<1x32x16xbf16>
        %111 = vector.shape_cast %110 : vector<1x32x16xbf16> to vector<32x16xbf16>
        %cst_57 = arith.constant dense<0.000000e+00> : vector<8x16xf32>
        %112 = tpu.matmul %98, %111, %cst_57 {dimension_numbers = #tpu.dot_dimension_numbers<[1], [0], [0], [1], [0, 0, 1, 1], [], []>} : vector<8x32xbf16>, vector<32x16xbf16>, vector<8x16xf32> -> vector<8x16xf32>
        %113 = arith.index_cast %arg22 : i32 to index
        %c0_58 = arith.constant 0 : index
        %c0_59 = arith.constant 0 : index
        %114 = vector.load %arg8[%113, %c0_58, %c0_59] : memref<2x1x16xf32, #tpu.memory_space<vmem>>, vector<1x1x16xf32>
        %115 = vector.shape_cast %114 : vector<1x1x16xf32> to vector<1x16xf32>
        %116 = vector.broadcast %115 : vector<1x16xf32> to vector<8x16xf32>
        %117 = arith.addf %112, %116 : vector<8x16xf32>
        %118 = arith.truncf %108 : vector<8x16xf32> to vector<8x16xbf16>
        %119 = arith.index_cast %arg22 : i32 to index
        %c0_60 = arith.constant 0 : index
        %c0_61 = arith.constant 0 : index
        %120 = vector.load %arg20[%119, %c0_60, %c0_61] : memref<2x8x16xbf16, #tpu.memory_space<vmem>>, vector<1x8x16xbf16>
        %121 = vector.shape_cast %120 : vector<1x8x16xbf16> to vector<8x16xbf16>
        %122 = vector.shape_cast %118 : vector<8x16xbf16> to vector<1x8x16xbf16>
        tpu.vector_store %arg20[%119, %c0_60, %c0_61], %122 {strides = array<i32>} : memref<2x8x16xbf16, #tpu.memory_space<vmem>>, vector<1x8x16xbf16>,
        %123 = arith.truncf %117 : vector<8x16xf32> to vector<8x16xbf16>
        %124 = arith.index_cast %arg22 : i32 to index
        %c0_62 = arith.constant 0 : index
        %c0_63 = arith.constant 0 : index
        %125 = vector.load %arg21[%124, %c0_62, %c0_63] : memref<2x8x16xbf16, #tpu.memory_space<vmem>>, vector<1x8x16xbf16>
        %126 = vector.shape_cast %125 : vector<1x8x16xbf16> to vector<8x16xbf16>
        %127 = vector.shape_cast %123 : vector<8x16xbf16> to vector<1x8x16xbf16>
        tpu.vector_store %arg21[%124, %c0_62, %c0_63], %127 {strides = array<i32>} : memref<2x8x16xbf16, #tpu.memory_space<vmem>>, vector<1x8x16xbf16>,
      }
      %c2_i32_49 = arith.constant 2 : i32
    } else {
    }
    %c8_i32 = arith.constant 8 : i32
    %3 = arith.muli %arg1, %c8_i32 : i32
    %4 = tpu.assume_multiple %3, 8 : i32
    %c0 = arith.constant 0 : index
    %5 = arith.index_cast %4 : i32 to index
    %c0_1 = arith.constant 0 : index
    %6 = vector.load %arg2[%c0, %5, %c0_1] : memref<1x8x32xf32, #tpu.memory_space<vmem>>, vector<1x8x32xf32>
    %7 = vector.shape_cast %6 : vector<1x8x32xf32> to vector<8x32xf32>
    %8 = arith.truncf %7 : vector<8x32xf32> to vector<8x32xbf16>
    %cst = arith.constant 0.000000e+00 : f32
    %9 = vector.broadcast %cst : f32 to vector<8x32xf32>
    %c0_i32_2 = arith.constant 0 : i32
    %c2_i32 = arith.constant 2 : i32
    %10 = arith.addi %c0_i32_2, %c2_i32 : i32
    %c1_i32 = arith.constant 1 : i32
    %11 = scf.for %arg22 = %c0_i32_2 to %10 step %c1_i32 iter_args(%arg23 = %9) -> (vector<8x32xf32>)  : i32 {
      %96 = arith.index_cast %arg22 : i32 to index
      %c0_43 = arith.constant 0 : index
      %c0_44 = arith.constant 0 : index
      %97 = vector.load %arg3[%96, %c0_43, %c0_44] : memref<2x32x16xbf16, #tpu.memory_space<vmem>>, vector<1x32x16xbf16>
      %98 = vector.shape_cast %97 : vector<1x32x16xbf16> to vector<32x16xbf16>
      %cst_45 = arith.constant dense<0.000000e+00> : vector<8x16xf32>
      %99 = tpu.matmul %8, %98, %cst_45 {dimension_numbers = #tpu.dot_dimension_numbers<[1], [0], [0], [1], [0, 0, 1, 1], [], []>} : vector<8x32xbf16>, vector<32x16xbf16>, vector<8x16xf32> -> vector<8x16xf32>
      %100 = arith.index_cast %arg22 : i32 to index
      %c0_46 = arith.constant 0 : index
      %c0_47 = arith.constant 0 : index
      %101 = vector.load %arg4[%100, %c0_46, %c0_47] : memref<2x1x16xf32, #tpu.memory_space<vmem>>, vector<1x1x16xf32>
      %102 = vector.shape_cast %101 : vector<1x1x16xf32> to vector<1x16xf32>
      %103 = vector.broadcast %102 : vector<1x16xf32> to vector<8x16xf32>
      %104 = arith.addf %99, %103 : vector<8x16xf32>
      %cst_48 = arith.constant 2.500000e-01 : f32
      %105 = vector.broadcast %cst_48 : f32 to vector<8x16xf32>
      %106 = arith.mulf %104, %105 : vector<8x16xf32>
      %107 = arith.truncf %106 : vector<8x16xf32> to vector<8x16xbf16>
      %cst_49 = arith.constant 0xFF800000 : f32
      %108 = vector.broadcast %cst_49 : f32 to vector<8x1xf32>
      %cst_50 = arith.constant 0.000000e+00 : f32
      %109 = vector.broadcast %cst_50 : f32 to vector<8x1xf32>
      %cst_51 = arith.constant 0.000000e+00 : f32
      %110 = vector.broadcast %cst_51 : f32 to vector<8x16xf32>
      %c0_i32_52 = arith.constant 0 : i32
      %c8_i32_53 = arith.constant 8 : i32
      %111 = arith.muli %c0_i32_52, %c8_i32_53 : i32
      %112 = tpu.assume_multiple %111, 8 : i32
      %113 = arith.index_cast %arg22 : i32 to index
      %114 = arith.index_cast %112 : i32 to index
      %c0_54 = arith.constant 0 : index
      %115 = vector.load %arg20[%113, %114, %c0_54] : memref<2x8x16xbf16, #tpu.memory_space<vmem>>, vector<1x8x16xbf16>
      %116 = vector.shape_cast %115 : vector<1x8x16xbf16> to vector<8x16xbf16>
      %117 = arith.index_cast %arg22 : i32 to index
      %118 = arith.index_cast %112 : i32 to index
      %c0_55 = arith.constant 0 : index
      %119 = vector.load %arg21[%117, %118, %c0_55] : memref<2x8x16xbf16, #tpu.memory_space<vmem>>, vector<1x8x16xbf16>
      %120 = vector.shape_cast %119 : vector<1x8x16xbf16> to vector<8x16xbf16>
      %cst_56 = arith.constant dense<0.000000e+00> : vector<8x8xf32>
      %121 = tpu.matmul %107, %116, %cst_56 {dimension_numbers = #tpu.dot_dimension_numbers<[1], [1], [0], [0], [0, 0, 1, 0], [], []>} : vector<8x16xbf16>, vector<8x16xbf16>, vector<8x8xf32> -> vector<8x8xf32>
      %cst_57 = arith.constant dense<0xFF800000> : vector<8xf32>
      %122 = vector.multi_reduction <maximumf>, %121, %cst_57 [1] : vector<8x8xf32> to vector<8xf32>
      %123 = vector.shape_cast %122 : vector<8xf32> to vector<8x1xf32>
      %124 = arith.maximumf %108, %123 : vector<8x1xf32>
      %125 = arith.subf %108, %124 : vector<8x1xf32>
      %126 = math.exp %125 : vector<8x1xf32>
      %127 = vector.broadcast %124 : vector<8x1xf32> to vector<8x8xf32>
      %128 = arith.subf %121, %127 : vector<8x8xf32>
      %129 = math.exp %128 : vector<8x8xf32>
      %130 = arith.mulf %126, %109 : vector<8x1xf32>
      %cst_58 = arith.constant dense<0.000000e+00> : vector<8xf32>
      %131 = vector.multi_reduction <add>, %129, %cst_58 [1] : vector<8x8xf32> to vector<8xf32>
      %132 = vector.shape_cast %131 : vector<8xf32> to vector<8x1xf32>
      %133 = arith.addf %130, %132 : vector<8x1xf32>
      %134 = vector.broadcast %126 : vector<8x1xf32> to vector<8x16xf32>
      %135 = arith.mulf %134, %110 : vector<8x16xf32>
      %136 = arith.truncf %129 : vector<8x8xf32> to vector<8x8xbf16>
      %cst_59 = arith.constant dense<0.000000e+00> : vector<8x16xf32>
      %137 = tpu.matmul %136, %120, %cst_59 {dimension_numbers = #tpu.dot_dimension_numbers<[1], [0], [0], [1], [0, 0, 1, 1], [], []>} : vector<8x8xbf16>, vector<8x16xbf16>, vector<8x16xf32> -> vector<8x16xf32>
      %138 = arith.addf %135, %137 : vector<8x16xf32>
      %c1_i32_60 = arith.constant 1 : i32
      %139 = tpu.reciprocal %133 {approx = true} : vector<8x1xf32> -> vector<8x1xf32>
      %140 = vector.broadcast %139 : vector<8x1xf32> to vector<8x16xf32>
      %141 = arith.mulf %138, %140 : vector<8x16xf32>
      %142 = arith.truncf %141 : vector<8x16xf32> to vector<8x16xbf16>
      %143 = arith.index_cast %arg22 : i32 to index
      %c0_61 = arith.constant 0 : index
      %c0_62 = arith.constant 0 : index
      %144 = vector.load %arg9[%143, %c0_61, %c0_62] : memref<2x16x32xbf16, #tpu.memory_space<vmem>>, vector<1x16x32xbf16>
      %145 = vector.shape_cast %144 : vector<1x16x32xbf16> to vector<16x32xbf16>
      %cst_63 = arith.constant dense<0.000000e+00> : vector<8x32xf32>
      %146 = tpu.matmul %142, %145, %cst_63 {dimension_numbers = #tpu.dot_dimension_numbers<[1], [0], [0], [1], [0, 0, 1, 1], [], []>} : vector<8x16xbf16>, vector<16x32xbf16>, vector<8x32xf32> -> vector<8x32xf32>
      %147 = arith.addf %arg23, %146 : vector<8x32xf32>
      scf.yield %147 : vector<8x32xf32>
    }
    %c2_i32_3 = arith.constant 2 : i32
    %c0_4 = arith.constant 0 : index
    %c0_5 = arith.constant 0 : index
    %12 = vector.load %arg10[%c0_4, %c0_5] : memref<1x32xf32, #tpu.memory_space<vmem>>, vector<1x32xf32>
    %13 = vector.broadcast %12 : vector<1x32xf32> to vector<8x32xf32>
    %14 = arith.addf %11, %13 : vector<8x32xf32>
    %15 = arith.addf %14, %7 : vector<8x32xf32>
    %c0_6 = arith.constant 0 : index
    %c0_7 = arith.constant 0 : index
    %16 = vector.load %arg11[%c0_6, %c0_7] : memref<1x32xf32, #tpu.memory_space<vmem>>, vector<1x32xf32>
    %c0_8 = arith.constant 0 : index
    %c0_9 = arith.constant 0 : index
    %17 = vector.load %arg12[%c0_8, %c0_9] : memref<1x32xf32, #tpu.memory_space<vmem>>, vector<1x32xf32>
    %cst_10 = arith.constant dense<0.000000e+00> : vector<8xf32>
    %18 = vector.multi_reduction <add>, %15, %cst_10 [1] : vector<8x32xf32> to vector<8xf32>
    %19 = vector.shape_cast %18 : vector<8xf32> to vector<8x1xf32>
    %cst_11 = arith.constant 3.200000e+01 : f32
    %20 = vector.broadcast %cst_11 : f32 to vector<8x1xf32>
    %21 = arith.divf %19, %20 : vector<8x1xf32>
    %22 = vector.broadcast %21 : vector<8x1xf32> to vector<8x32xf32>
    %23 = arith.subf %15, %22 : vector<8x32xf32>
    %24 = arith.mulf %23, %23 : vector<8x32xf32>
    %cst_12 = arith.constant dense<0.000000e+00> : vector<8xf32>
    %25 = vector.multi_reduction <add>, %24, %cst_12 [1] : vector<8x32xf32> to vector<8xf32>
    %26 = vector.shape_cast %25 : vector<8xf32> to vector<8x1xf32>
    %cst_13 = arith.constant 3.200000e+01 : f32
    %27 = vector.broadcast %cst_13 : f32 to vector<8x1xf32>
    %28 = arith.divf %26, %27 : vector<8x1xf32>
    %cst_14 = arith.constant 9.99999996E-13 : f32
    %29 = vector.broadcast %cst_14 : f32 to vector<8x1xf32>
    %30 = arith.addf %28, %29 : vector<8x1xf32>
    %31 = math.rsqrt %30 : vector<8x1xf32>
    %32 = vector.broadcast %21 : vector<8x1xf32> to vector<8x32xf32>
    %33 = arith.subf %15, %32 : vector<8x32xf32>
    %34 = vector.broadcast %31 : vector<8x1xf32> to vector<8x32xf32>
    %35 = arith.mulf %33, %34 : vector<8x32xf32>
    %36 = vector.broadcast %16 : vector<1x32xf32> to vector<8x32xf32>
    %37 = arith.mulf %35, %36 : vector<8x32xf32>
    %38 = vector.broadcast %17 : vector<1x32xf32> to vector<8x32xf32>
    %39 = arith.addf %37, %38 : vector<8x32xf32>
    %40 = arith.truncf %39 : vector<8x32xf32> to vector<8x32xbf16>
    %cst_15 = arith.constant 0.000000e+00 : f32
    %41 = vector.broadcast %cst_15 : f32 to vector<8x32xf32>
    %c0_i32_16 = arith.constant 0 : i32
    %42 = arith.index_cast %c0_i32_16 : i32 to index
    %c0_17 = arith.constant 0 : index
    %c0_18 = arith.constant 0 : index
    %43 = vector.load %arg13[%42, %c0_17, %c0_18] : memref<1x32x64xbf16, #tpu.memory_space<vmem>>, vector<1x32x64xbf16>
    %44 = vector.shape_cast %43 : vector<1x32x64xbf16> to vector<32x64xbf16>
    %cst_19 = arith.constant dense<0.000000e+00> : vector<8x64xf32>
    %45 = tpu.matmul %40, %44, %cst_19 {dimension_numbers = #tpu.dot_dimension_numbers<[1], [0], [0], [1], [0, 0, 1, 1], [], []>} : vector<8x32xbf16>, vector<32x64xbf16>, vector<8x64xf32> -> vector<8x64xf32>
    %46 = arith.index_cast %c0_i32_16 : i32 to index
    %c0_20 = arith.constant 0 : index
    %c0_21 = arith.constant 0 : index
    %47 = vector.load %arg14[%46, %c0_20, %c0_21] : memref<1x1x64xf32, #tpu.memory_space<vmem>>, vector<1x1x64xf32>
    %48 = vector.shape_cast %47 : vector<1x1x64xf32> to vector<1x64xf32>
    %49 = vector.broadcast %48 : vector<1x64xf32> to vector<8x64xf32>
    %50 = arith.addf %45, %49 : vector<8x64xf32>
    %cst_22 = arith.constant 5.000000e-01 : f32
    %51 = vector.broadcast %cst_22 : f32 to vector<8x64xf32>
    %52 = arith.mulf %51, %50 : vector<8x64xf32>
    %cst_23 = arith.constant 0.707106769 : f32
    %53 = vector.broadcast %cst_23 : f32 to vector<8x64xf32>
    %54 = arith.mulf %50, %53 : vector<8x64xf32>
    %55 = math.erf %54 : vector<8x64xf32>
    %cst_24 = arith.constant 1.000000e+00 : f32
    %56 = vector.broadcast %cst_24 : f32 to vector<8x64xf32>
    %57 = arith.addf %56, %55 : vector<8x64xf32>
    %58 = arith.mulf %52, %57 : vector<8x64xf32>
    %59 = arith.truncf %58 : vector<8x64xf32> to vector<8x64xbf16>
    %60 = arith.index_cast %c0_i32_16 : i32 to index
    %c0_25 = arith.constant 0 : index
    %c0_26 = arith.constant 0 : index
    %61 = vector.load %arg15[%60, %c0_25, %c0_26] : memref<1x64x32xbf16, #tpu.memory_space<vmem>>, vector<1x64x32xbf16>
    %62 = vector.shape_cast %61 : vector<1x64x32xbf16> to vector<64x32xbf16>
    %cst_27 = arith.constant dense<0.000000e+00> : vector<8x32xf32>
    %63 = tpu.matmul %59, %62, %cst_27 {dimension_numbers = #tpu.dot_dimension_numbers<[1], [0], [0], [1], [0, 0, 1, 1], [], []>} : vector<8x64xbf16>, vector<64x32xbf16>, vector<8x32xf32> -> vector<8x32xf32>
    %64 = arith.addf %41, %63 : vector<8x32xf32>
    %c1_i32_28 = arith.constant 1 : i32
    %c0_29 = arith.constant 0 : index
    %c0_30 = arith.constant 0 : index
    %65 = vector.load %arg16[%c0_29, %c0_30] : memref<1x32xf32, #tpu.memory_space<vmem>>, vector<1x32xf32>
    %66 = vector.broadcast %65 : vector<1x32xf32> to vector<8x32xf32>
    %67 = arith.addf %64, %66 : vector<8x32xf32>
    %68 = arith.addf %67, %39 : vector<8x32xf32>
    %c0_31 = arith.constant 0 : index
    %c0_32 = arith.constant 0 : index
    %69 = vector.load %arg17[%c0_31, %c0_32] : memref<1x32xf32, #tpu.memory_space<vmem>>, vector<1x32xf32>
    %c0_33 = arith.constant 0 : index
    %c0_34 = arith.constant 0 : index
    %70 = vector.load %arg18[%c0_33, %c0_34] : memref<1x32xf32, #tpu.memory_space<vmem>>, vector<1x32xf32>
    %cst_35 = arith.constant dense<0.000000e+00> : vector<8xf32>
    %71 = vector.multi_reduction <add>, %68, %cst_35 [1] : vector<8x32xf32> to vector<8xf32>
    %72 = vector.shape_cast %71 : vector<8xf32> to vector<8x1xf32>
    %cst_36 = arith.constant 3.200000e+01 : f32
    %73 = vector.broadcast %cst_36 : f32 to vector<8x1xf32>
    %74 = arith.divf %72, %73 : vector<8x1xf32>
    %75 = vector.broadcast %74 : vector<8x1xf32> to vector<8x32xf32>
    %76 = arith.subf %68, %75 : vector<8x32xf32>
    %77 = arith.mulf %76, %76 : vector<8x32xf32>
    %cst_37 = arith.constant dense<0.000000e+00> : vector<8xf32>
    %78 = vector.multi_reduction <add>, %77, %cst_37 [1] : vector<8x32xf32> to vector<8xf32>
    %79 = vector.shape_cast %78 : vector<8xf32> to vector<8x1xf32>
    %cst_38 = arith.constant 3.200000e+01 : f32
    %80 = vector.broadcast %cst_38 : f32 to vector<8x1xf32>
    %81 = arith.divf %79, %80 : vector<8x1xf32>
    %cst_39 = arith.constant 9.99999996E-13 : f32
    %82 = vector.broadcast %cst_39 : f32 to vector<8x1xf32>
    %83 = arith.addf %81, %82 : vector<8x1xf32>
    %84 = math.rsqrt %83 : vector<8x1xf32>
    %85 = vector.broadcast %74 : vector<8x1xf32> to vector<8x32xf32>
    %86 = arith.subf %68, %85 : vector<8x32xf32>
    %87 = vector.broadcast %84 : vector<8x1xf32> to vector<8x32xf32>
    %88 = arith.mulf %86, %87 : vector<8x32xf32>
    %89 = vector.broadcast %69 : vector<1x32xf32> to vector<8x32xf32>
    %90 = arith.mulf %88, %89 : vector<8x32xf32>
    %91 = vector.broadcast %70 : vector<1x32xf32> to vector<8x32xf32>
    %92 = arith.addf %90, %91 : vector<8x32xf32>
    %c0_40 = arith.constant 0 : index
    %c0_41 = arith.constant 0 : index
    %c0_42 = arith.constant 0 : index
    %93 = vector.load %arg19[%c0_40, %c0_41, %c0_42] : memref<1x8x32xf32, #tpu.memory_space<vmem>>, vector<1x8x32xf32>
    %94 = vector.shape_cast %93 : vector<1x8x32xf32> to vector<8x32xf32>
    %95 = vector.shape_cast %92 : vector<8x32xf32> to vector<1x8x32xf32>
    tpu.vector_store %arg19[%c0_40, %c0_41, %c0_42], %95 {strides = array<i32>} : memref<1x8x32xf32, #tpu.memory_space<vmem>>, vector<1x8x32xf32>,
    return
  }
  func.func @transform_0(%arg0: i32, %arg1: i32) -> (i32, i32, i32) {
    %c0_i32 = arith.constant 0 : i32
    %c0_i32_0 = arith.constant 0 : i32
    %c0_i32_1 = arith.constant 0 : i32
    return %arg0, %c0_i32, %c0_i32_0 : i32, i32, i32
  }
  func.func @transform_1(%arg0: i32, %arg1: i32) -> (i32, i32, i32) {
    %c0_i32 = arith.constant 0 : i32
    %c0_i32_0 = arith.constant 0 : i32
    %c0_i32_1 = arith.constant 0 : i32
    %c0_i32_2 = arith.constant 0 : i32
    return %c0_i32, %c0_i32_0, %c0_i32_1 : i32, i32, i32
  }
  func.func @transform_2(%arg0: i32, %arg1: i32) -> (i32, i32, i32) {
    %c0_i32 = arith.constant 0 : i32
    %c0_i32_0 = arith.constant 0 : i32
    %c0_i32_1 = arith.constant 0 : i32
    %c0_i32_2 = arith.constant 0 : i32
    return %c0_i32, %c0_i32_0, %c0_i32_1 : i32, i32, i32
  }
  func.func @transform_3(%arg0: i32, %arg1: i32) -> (i32, i32, i32) {
    %c0_i32 = arith.constant 0 : i32
    %c0_i32_0 = arith.constant 0 : i32
    %c0_i32_1 = arith.constant 0 : i32
    %c0_i32_2 = arith.constant 0 : i32
    return %c0_i32, %c0_i32_0, %c0_i32_1 : i32, i32, i32
  }
  func.func @transform_4(%arg0: i32, %arg1: i32) -> (i32, i32, i32) {
    %c0_i32 = arith.constant 0 : i32
    %c0_i32_0 = arith.constant 0 : i32
    %c0_i32_1 = arith.constant 0 : i32
    %c0_i32_2 = arith.constant 0 : i32
    return %c0_i32, %c0_i32_0, %c0_i32_1 : i32, i32, i32
  }
  func.func @transform_5(%arg0: i32, %arg1: i32) -> (i32, i32, i32) {
    %c0_i32 = arith.constant 0 : i32
    %c0_i32_0 = arith.constant 0 : i32
    %c0_i32_1 = arith.constant 0 : i32
    %c0_i32_2 = arith.constant 0 : i32
    return %c0_i32, %c0_i32_0, %c0_i32_1 : i32, i32, i32
  }
  func.func @transform_6(%arg0: i32, %arg1: i32) -> (i32, i32, i32) {
    %c0_i32 = arith.constant 0 : i32
    %c0_i32_0 = arith.constant 0 : i32
    %c0_i32_1 = arith.constant 0 : i32
    %c0_i32_2 = arith.constant 0 : i32
    return %c0_i32, %c0_i32_0, %c0_i32_1 : i32, i32, i32
  }
  func.func @transform_7(%arg0: i32, %arg1: i32) -> (i32, i32, i32) {
    %c0_i32 = arith.constant 0 : i32
    %c0_i32_0 = arith.constant 0 : i32
    %c0_i32_1 = arith.constant 0 : i32
    %c0_i32_2 = arith.constant 0 : i32
    return %c0_i32, %c0_i32_0, %c0_i32_1 : i32, i32, i32
  }
  func.func @transform_8(%arg0: i32, %arg1: i32) -> (i32, i32) {
    %c0_i32 = arith.constant 0 : i32
    %c0_i32_0 = arith.constant 0 : i32
    %c0_i32_1 = arith.constant 0 : i32
    return %c0_i32, %c0_i32_0 : i32, i32
  }
  func.func @transform_9(%arg0: i32, %arg1: i32) -> (i32, i32) {
    %c0_i32 = arith.constant 0 : i32
    %c0_i32_0 = arith.constant 0 : i32
    %c0_i32_1 = arith.constant 0 : i32
    return %c0_i32, %c0_i32_0 : i32, i32
  }
  func.func @transform_10(%arg0: i32, %arg1: i32) -> (i32, i32) {
    %c0_i32 = arith.constant 0 : i32
    %c0_i32_0 = arith.constant 0 : i32
    %c0_i32_1 = arith.constant 0 : i32
    return %c0_i32, %c0_i32_0 : i32, i32
  }
  func.func @transform_11(%arg0: i32, %arg1: i32) -> (i32, i32, i32) {
    %c0_i32 = arith.constant 0 : i32
    %c0_i32_0 = arith.constant 0 : i32
    %c0_i32_1 = arith.constant 0 : i32
    %c0_i32_2 = arith.constant 0 : i32
    return %c0_i32, %c0_i32_0, %c0_i32_1 : i32, i32, i32
  }
  func.func @transform_12(%arg0: i32, %arg1: i32) -> (i32, i32, i32) {
    %c0_i32 = arith.constant 0 : i32
    %c0_i32_0 = arith.constant 0 : i32
    %c0_i32_1 = arith.constant 0 : i32
    %c0_i32_2 = arith.constant 0 : i32
    return %c0_i32, %c0_i32_0, %c0_i32_1 : i32, i32, i32
  }
  func.func @transform_13(%arg0: i32, %arg1: i32) -> (i32, i32, i32) {
    %c0_i32 = arith.constant 0 : i32
    %c0_i32_0 = arith.constant 0 : i32
    %c0_i32_1 = arith.constant 0 : i32
    %c0_i32_2 = arith.constant 0 : i32
    return %c0_i32, %c0_i32_0, %c0_i32_1 : i32, i32, i32
  }
  func.func @transform_14(%arg0: i32, %arg1: i32) -> (i32, i32) {
    %c0_i32 = arith.constant 0 : i32
    %c0_i32_0 = arith.constant 0 : i32
    %c0_i32_1 = arith.constant 0 : i32
    return %c0_i32, %c0_i32_0 : i32, i32
  }
  func.func @transform_15(%arg0: i32, %arg1: i32) -> (i32, i32) {
    %c0_i32 = arith.constant 0 : i32
    %c0_i32_0 = arith.constant 0 : i32
    %c0_i32_1 = arith.constant 0 : i32
    return %c0_i32, %c0_i32_0 : i32, i32
  }
  func.func @transform_16(%arg0: i32, %arg1: i32) -> (i32, i32) {
    %c0_i32 = arith.constant 0 : i32
    %c0_i32_0 = arith.constant 0 : i32
    %c0_i32_1 = arith.constant 0 : i32
    return %c0_i32, %c0_i32_0 : i32, i32
  }
  func.func @transform_17(%arg0: i32, %arg1: i32) -> (i32, i32, i32) {
    %c0_i32 = arith.constant 0 : i32
    %c0_i32_0 = arith.constant 0 : i32
    return %arg0, %arg1, %c0_i32 : i32, i32, i32
  }
}

module attributes {stable_mosaic.version = 11 : i64} {
  func.func @kernel(%arg0: i32, %arg1: i32, %arg2: memref<1x8x32xf32, #tpu.memory_space<vmem>>, %arg3: memref<2x32x16xbf16, #tpu.memory_space<vmem>>, %arg4: memref<2x1x16xf32, #tpu.memory_space<vmem>>, %arg5: memref<2x32x16xbf16, #tpu.memory_space<vmem>>, %arg6: memref<2x1x16xf32, #tpu.memory_space<vmem>>, %arg7: memref<2x32x16xbf16, #tpu.memory_space<vmem>>, %arg8: memref<2x1x16xf32, #tpu.memory_space<vmem>>, %arg9: memref<2x16x32xbf16, #tpu.memory_space<vmem>>, %arg10: memref<1x32xf32, #tpu.memory_space<vmem>>, %arg11: memref<1x32xf32, #tpu.memory_space<vmem>>, %arg12: memref<1x32xf32, #tpu.memory_space<vmem>>, %arg13: memref<1x32x64xbf16, #tpu.memory_space<vmem>>, %arg14: memref<1x1x64xf32, #tpu.memory_space<vmem>>, %arg15: memref<1x64x32xbf16, #tpu.memory_space<vmem>>, %arg16: memref<1x32xf32, #tpu.memory_space<vmem>>, %arg17: memref<1x32xf32, #tpu.memory_space<vmem>>, %arg18: memref<1x32xf32, #tpu.memory_space<vmem>>, %arg19: memref<1x8x32xf32, #tpu.memory_space<vmem>>, %arg20: memref<2x8x16xbf16, #tpu.memory_space<vmem>>, %arg21: memref<2x8x16xbf16, #tpu.memory_space<vmem>>) attributes {dimension_semantics = [#tpu.dimension_semantics<parallel>, #tpu.dimension_semantics<arbitrary>], iteration_bounds = array<i64: 2, 1>, scalar_prefetch = 0 : i64, scratch_operands = 2 : i64, tpu.core_type = #tpu.core_type<tc>, window_params = [{transform_indices = @transform_0, window_bounds = array<i64: 1, 8, 32>}, {pipeline_mode = #tpu.pipeline_mode<synchronous>, transform_indices = @transform_1, window_bounds = array<i64: 2, 32, 16>}, {pipeline_mode = #tpu.pipeline_mode<synchronous>, transform_indices = @transform_2, window_bounds = array<i64: 2, 1, 16>}, {pipeline_mode = #tpu.pipeline_mode<synchronous>, transform_indices = @transform_3, window_bounds = array<i64: 2, 32, 16>}, {pipeline_mode = #tpu.pipeline_mode<synchronous>, transform_indices = @transform_4, window_bounds = array<i64: 2, 1, 16>}, {pipeline_mode = #tpu.pipeline_mode<synchronous>, transform_indices = @transform_5, window_bounds = array<i64: 2, 32, 16>}, {pipeline_mode = #tpu.pipeline_mode<synchronous>, transform_indices = @transform_6, window_bounds = array<i64: 2, 1, 16>}, {pipeline_mode = #tpu.pipeline_mode<synchronous>, transform_indices = @transform_7, window_bounds = array<i64: 2, 16, 32>}, {pipeline_mode = #tpu.pipeline_mode<synchronous>, transform_indices = @transform_8, window_bounds = array<i64: 1, 32>}, {pipeline_mode = #tpu.pipeline_mode<synchronous>, transform_indices = @transform_9, window_bounds = array<i64: 1, 32>}, {pipeline_mode = #tpu.pipeline_mode<synchronous>, transform_indices = @transform_10, window_bounds = array<i64: 1, 32>}, {pipeline_mode = #tpu.pipeline_mode<synchronous>, transform_indices = @transform_11, window_bounds = array<i64: 1, 32, 64>}, {pipeline_mode = #tpu.pipeline_mode<synchronous>, transform_indices = @transform_12, window_bounds = array<i64: 1, 1, 64>}, {pipeline_mode = #tpu.pipeline_mode<synchronous>, transform_indices = @transform_13, window_bounds = array<i64: 1, 64, 32>}, {pipeline_mode = #tpu.pipeline_mode<synchronous>, transform_indices = @transform_14, window_bounds = array<i64: 1, 32>}, {pipeline_mode = #tpu.pipeline_mode<synchronous>, transform_indices = @transform_15, window_bounds = array<i64: 1, 32>}, {pipeline_mode = #tpu.pipeline_mode<synchronous>, transform_indices = @transform_16, window_bounds = array<i64: 1, 32>}, {transform_indices = @transform_17, window_bounds = array<i64: 1, 8, 32>}]} {
    %c0_i32 = arith.constant 0 : i32
    %0 = arith.cmpi eq, %arg1, %c0_i32 : i32
    %1 = arith.extui %0 : i1 to i32
    %c0_i32_0 = arith.constant 0 : i32
    %2 = arith.cmpi ne, %1, %c0_i32_0 : i32
    scf.if %2 {
      %c0_43 = arith.constant 0 : index
      %c0_44 = arith.constant 0 : index
      %c0_45 = arith.constant 0 : index
      %96 = vector.load %arg2[%c0_43, %c0_44, %c0_45] : memref<1x8x32xf32, #tpu.memory_space<vmem>>, vector<1x8x32xf32>
      %97 = vector.shape_cast %96 : vector<1x8x32xf32> to vector<8x32xf32>
      %98 = arith.truncf %97 : vector<8x32xf32> to vector<8x32xbf16>
      %c0_i32_46 = arith.constant 0 : i32
      %c2_i32_47 = arith.constant 2 : i32
      %99 = arith.addi %c0_i32_46, %c2_i32_47 : i32
      %c1_i32_48 = arith.constant 1 : i32
      scf.for %arg22 = %c0_i32_46 to %99 step %c1_i32_48  : i32 {
        %100 = arith.index_cast %arg22 : i32 to index
        %c0_50 = arith.constant 0 : index
        %c0_51 = arith.constant 0 : index
        %101 = vector.load %arg5[%100, %c0_50, %c0_51] : memref<2x32x16xbf16, #tpu.memory_space<vmem>>, vector<1x32x16xbf16>
        %102 = vector.shape_cast %101 : vector<1x32x16xbf16> to vector<32x16xbf16>
        %cst_52 = arith.constant dense<0.000000e+00> : vector<8x16xf32>
        %103 = tpu.matmul %98, %102, %cst_52 {dimension_numbers = #tpu.dot_dimension_numbers<[1], [0], [0], [1], [0, 0, 1, 1], [], []>} : vector<8x32xbf16>, vector<32x16xbf16>, vector<8x16xf32> -> vector<8x16xf32>
        %104 = arith.index_cast %arg22 : i32 to index
        %c0_53 = arith.constant 0 : index
        %c0_54 = arith.constant 0 : index
        %105 = vector.load %arg6[%104, %c0_53, %c0_54] : memref<2x1x16xf32, #tpu.memory_space<vmem>>, vector<1x1x16xf32>
        %106 = vector.shape_cast %105 : vector<1x1x16xf32> to vector<1x16xf32>
        %107 = vector.broadcast %106 : vector<1x16xf32> to vector<8x16xf32>
        %108 = arith.addf %103, %107 : vector<8x16xf32>
        %109 = arith.index_cast %arg22 : i32 to index
        %c0_55 = arith.constant 0 : index
        %c0_56 = arith.constant 0 : index
        %110 = vector.load %arg7[%109, %c0_55, %c0_56] : memref<2x32x16xbf16, #tpu.memory_space<vmem>>, vector<1x32x16xbf16>
        %111 = vector.shape_cast %110 : vector<1x32x16xbf16> to vector<32x16xbf16>
        %cst_57 = arith.constant dense<0.000000e+00> : vector<8x16xf32>
        %112 = tpu.matmul %98, %111, %cst_57 {dimension_numbers = #tpu.dot_dimension_numbers<[1], [0], [0], [1], [0, 0, 1, 1], [], []>} : vector<8x32xbf16>, vector<32x16xbf16>, vector<8x16xf32> -> vector<8x16xf32>
        %113 = arith.index_cast %arg22 : i32 to index
        %c0_58 = arith.constant 0 : index
        %c0_59 = arith.constant 0 : index
        %114 = vector.load %arg8[%113, %c0_58, %c0_59] : memref<2x1x16xf32, #tpu.memory_space<vmem>>, vector<1x1x16xf32>
        %115 = vector.shape_cast %114 : vector<1x1x16xf32> to vector<1x16xf32>
        %116 = vector.broadcast %115 : vector<1x16xf32> to vector<8x16xf32>
        %117 = arith.addf %112, %116 : vector<8x16xf32>
        %118 = arith.truncf %108 : vector<8x16xf32> to vector<8x16xbf16>
        %119 = arith.index_cast %arg22 : i32 to index
        %c0_60 = arith.constant 0 : index
        %c0_61 = arith.constant 0 : index
        %120 = vector.load %arg20[%119, %c0_60, %c0_61] : memref<2x8x16xbf16, #tpu.memory_space<vmem>>, vector<1x8x16xbf16>
        %121 = vector.shape_cast %120 : vector<1x8x16xbf16> to vector<8x16xbf16>
        %122 = vector.shape_cast %118 : vector<8x16xbf16> to vector<1x8x16xbf16>
        tpu.vector_store %arg20[%119, %c0_60, %c0_61], %122 {strides = array<i32>} : memref<2x8x16xbf16, #tpu.memory_space<vmem>>, vector<1x8x16xbf16>,
        %123 = arith.truncf %117 : vector<8x16xf32> to vector<8x16xbf16>
        %124 = arith.index_cast %arg22 : i32 to index
        %c0_62 = arith.constant 0 : index
        %c0_63 = arith.constant 0 : index
        %125 = vector.load %arg21[%124, %c0_62, %c0_63] : memref<2x8x16xbf16, #tpu.memory_space<vmem>>, vector<1x8x16xbf16>
        %126 = vector.shape_cast %125 : vector<1x8x16xbf16> to vector<8x16xbf16>
        %127 = vector.shape_cast %123 : vector<8x16xbf16> to vector<1x8x16xbf16>
        tpu.vector_store %arg21[%124, %c0_62, %c0_63], %127 {strides = array<i32>} : memref<2x8x16xbf16, #tpu.memory_space<vmem>>, vector<1x8x16xbf16>,
      }
      %c2_i32_49 = arith.constant 2 : i32
    } else {
    }
    %c8_i32 = arith.constant 8 : i32
    %3 = arith.muli %arg1, %c8_i32 : i32
    %4 = tpu.assume_multiple %3, 8 : i32
    %c0 = arith.constant 0 : index
    %5 = arith.index_cast %4 : i32 to index
    %c0_1 = arith.constant 0 : index
    %6 = vector.load %arg2[%c0, %5, %c0_1] : memref<1x8x32xf32, #tpu.memory_space<vmem>>, vector<1x8x32xf32>
    %7 = vector.shape_cast %6 : vector<1x8x32xf32> to vector<8x32xf32>
    %8 = arith.truncf %7 : vector<8x32xf32> to vector<8x32xbf16>
    %cst = arith.constant 0.000000e+00 : f32
    %9 = vector.broadcast %cst : f32 to vector<8x32xf32>
    %c0_i32_2 = arith.constant 0 : i32
    %c2_i32 = arith.constant 2 : i32
    %10 = arith.addi %c0_i32_2, %c2_i32 : i32
    %c1_i32 = arith.constant 1 : i32
    %11 = scf.for %arg22 = %c0_i32_2 to %10 step %c1_i32 iter_args(%arg23 = %9) -> (vector<8x32xf32>)  : i32 {
      %96 = arith.index_cast %arg22 : i32 to index
      %c0_43 = arith.constant 0 : index
      %c0_44 = arith.constant 0 : index
      %97 = vector.load %arg3[%96, %c0_43, %c0_44] : memref<2x32x16xbf16, #tpu.memory_space<vmem>>, vector<1x32x16xbf16>
      %98 = vector.shape_cast %97 : vector<1x32x16xbf16> to vector<32x16xbf16>
      %cst_45 = arith.constant dense<0.000000e+00> : vector<8x16xf32>
      %99 = tpu.matmul %8, %98, %cst_45 {dimension_numbers = #tpu.dot_dimension_numbers<[1], [0], [0], [1], [0, 0, 1, 1], [], []>} : vector<8x32xbf16>, vector<32x16xbf16>, vector<8x16xf32> -> vector<8x16xf32>
      %100 = arith.index_cast %arg22 : i32 to index
      %c0_46 = arith.constant 0 : index
      %c0_47 = arith.constant 0 : index
      %101 = vector.load %arg4[%100, %c0_46, %c0_47] : memref<2x1x16xf32, #tpu.memory_space<vmem>>, vector<1x1x16xf32>
      %102 = vector.shape_cast %101 : vector<1x1x16xf32> to vector<1x16xf32>
      %103 = vector.broadcast %102 : vector<1x16xf32> to vector<8x16xf32>
      %104 = arith.addf %99, %103 : vector<8x16xf32>
      %cst_48 = arith.constant 2.500000e-01 : f32
      %105 = vector.broadcast %cst_48 : f32 to vector<8x16xf32>
      %106 = arith.mulf %104, %105 : vector<8x16xf32>
      %107 = arith.truncf %106 : vector<8x16xf32> to vector<8x16xbf16>
      %cst_49 = arith.constant 0xFF800000 : f32
      %108 = vector.broadcast %cst_49 : f32 to vector<8x1xf32>
      %cst_50 = arith.constant 0.000000e+00 : f32
      %109 = vector.broadcast %cst_50 : f32 to vector<8x1xf32>
      %cst_51 = arith.constant 0.000000e+00 : f32
      %110 = vector.broadcast %cst_51 : f32 to vector<8x16xf32>
      %c0_i32_52 = arith.constant 0 : i32
      %c8_i32_53 = arith.constant 8 : i32
      %111 = arith.muli %c0_i32_52, %c8_i32_53 : i32
      %112 = tpu.assume_multiple %111, 8 : i32
      %113 = arith.index_cast %arg22 : i32 to index
      %114 = arith.index_cast %112 : i32 to index
      %c0_54 = arith.constant 0 : index
      %115 = vector.load %arg20[%113, %114, %c0_54] : memref<2x8x16xbf16, #tpu.memory_space<vmem>>, vector<1x8x16xbf16>
      %116 = vector.shape_cast %115 : vector<1x8x16xbf16> to vector<8x16xbf16>
      %117 = arith.index_cast %arg22 : i32 to index
      %118 = arith.index_cast %112 : i32 to index
      %c0_55 = arith.constant 0 : index
      %119 = vector.load %arg21[%117, %118, %c0_55] : memref<2x8x16xbf16, #tpu.memory_space<vmem>>, vector<1x8x16xbf16>
      %120 = vector.shape_cast %119 : vector<1x8x16xbf16> to vector<8x16xbf16>
      %cst_56 = arith.constant dense<0.000000e+00> : vector<8x8xf32>
      %121 = tpu.matmul %107, %116, %cst_56 {dimension_numbers = #tpu.dot_dimension_numbers<[1], [1], [0], [0], [0, 0, 1, 0], [], []>} : vector<8x16xbf16>, vector<8x16xbf16>, vector<8x8xf32> -> vector<8x8xf32>
      %cst_57 = arith.constant dense<0xFF800000> : vector<8xf32>
      %122 = vector.multi_reduction <maximumf>, %121, %cst_57 [1] : vector<8x8xf32> to vector<8xf32>
      %123 = vector.shape_cast %122 : vector<8xf32> to vector<8x1xf32>
      %124 = arith.maximumf %108, %123 : vector<8x1xf32>
      %125 = arith.subf %108, %124 : vector<8x1xf32>
      %126 = math.exp %125 : vector<8x1xf32>
      %127 = vector.broadcast %124 : vector<8x1xf32> to vector<8x8xf32>
      %128 = arith.subf %121, %127 : vector<8x8xf32>
      %129 = math.exp %128 : vector<8x8xf32>
      %130 = arith.mulf %126, %109 : vector<8x1xf32>
      %cst_58 = arith.constant dense<0.000000e+00> : vector<8xf32>
      %131 = vector.multi_reduction <add>, %129, %cst_58 [1] : vector<8x8xf32> to vector<8xf32>
      %132 = vector.shape_cast %131 : vector<8xf32> to vector<8x1xf32>
      %133 = arith.addf %130, %132 : vector<8x1xf32>
      %134 = vector.broadcast %126 : vector<8x1xf32> to vector<8x16xf32>
      %135 = arith.mulf %134, %110 : vector<8x16xf32>
      %136 = arith.truncf %129 : vector<8x8xf32> to vector<8x8xbf16>
      %cst_59 = arith.constant dense<0.000000e+00> : vector<8x16xf32>
      %137 = tpu.matmul %136, %120, %cst_59 {dimension_numbers = #tpu.dot_dimension_numbers<[1], [0], [0], [1], [0, 0, 1, 1], [], []>} : vector<8x8xbf16>, vector<8x16xbf16>, vector<8x16xf32> -> vector<8x16xf32>
      %138 = arith.addf %135, %137 : vector<8x16xf32>
      %c1_i32_60 = arith.constant 1 : i32
      %139 = tpu.reciprocal %133 {approx = true} : vector<8x1xf32> -> vector<8x1xf32>
      %140 = vector.broadcast %139 : vector<8x1xf32> to vector<8x16xf32>
      %141 = arith.mulf %138, %140 : vector<8x16xf32>
      %142 = arith.truncf %141 : vector<8x16xf32> to vector<8x16xbf16>
      %143 = arith.index_cast %arg22 : i32 to index
      %c0_61 = arith.constant 0 : index
      %c0_62 = arith.constant 0 : index
      %144 = vector.load %arg9[%143, %c0_61, %c0_62] : memref<2x16x32xbf16, #tpu.memory_space<vmem>>, vector<1x16x32xbf16>
      %145 = vector.shape_cast %144 : vector<1x16x32xbf16> to vector<16x32xbf16>
      %cst_63 = arith.constant dense<0.000000e+00> : vector<8x32xf32>
      %146 = tpu.matmul %142, %145, %cst_63 {dimension_numbers = #tpu.dot_dimension_numbers<[1], [0], [0], [1], [0, 0, 1, 1], [], []>} : vector<8x16xbf16>, vector<16x32xbf16>, vector<8x32xf32> -> vector<8x32xf32>
      %147 = arith.addf %arg23, %146 : vector<8x32xf32>
      scf.yield %147 : vector<8x32xf32>
    }
    %c2_i32_3 = arith.constant 2 : i32
    %c0_4 = arith.constant 0 : index
    %c0_5 = arith.constant 0 : index
    %12 = vector.load %arg10[%c0_4, %c0_5] : memref<1x32xf32, #tpu.memory_space<vmem>>, vector<1x32xf32>
    %13 = vector.broadcast %12 : vector<1x32xf32> to vector<8x32xf32>
    %14 = arith.addf %11, %13 : vector<8x32xf32>
    %15 = arith.addf %14, %7 : vector<8x32xf32>
    %c0_6 = arith.constant 0 : index
    %c0_7 = arith.constant 0 : index
    %16 = vector.load %arg11[%c0_6, %c0_7] : memref<1x32xf32, #tpu.memory_space<vmem>>, vector<1x32xf32>
    %c0_8 = arith.constant 0 : index
    %c0_9 = arith.constant 0 : index
    %17 = vector.load %arg12[%c0_8, %c0_9] : memref<1x32xf32, #tpu.memory_space<vmem>>, vector<1x32xf32>
    %cst_10 = arith.constant dense<0.000000e+00> : vector<8xf32>
    %18 = vector.multi_reduction <add>, %15, %cst_10 [1] : vector<8x32xf32> to vector<8xf32>
    %19 = vector.shape_cast %18 : vector<8xf32> to vector<8x1xf32>
    %cst_11 = arith.constant 3.200000e+01 : f32
    %20 = vector.broadcast %cst_11 : f32 to vector<8x1xf32>
    %21 = arith.divf %19, %20 : vector<8x1xf32>
    %22 = vector.broadcast %21 : vector<8x1xf32> to vector<8x32xf32>
    %23 = arith.subf %15, %22 : vector<8x32xf32>
    %24 = arith.mulf %23, %23 : vector<8x32xf32>
    %cst_12 = arith.constant dense<0.000000e+00> : vector<8xf32>
    %25 = vector.multi_reduction <add>, %24, %cst_12 [1] : vector<8x32xf32> to vector<8xf32>
    %26 = vector.shape_cast %25 : vector<8xf32> to vector<8x1xf32>
    %cst_13 = arith.constant 3.200000e+01 : f32
    %27 = vector.broadcast %cst_13 : f32 to vector<8x1xf32>
    %28 = arith.divf %26, %27 : vector<8x1xf32>
    %cst_14 = arith.constant 9.99999996E-13 : f32
    %29 = vector.broadcast %cst_14 : f32 to vector<8x1xf32>
    %30 = arith.addf %28, %29 : vector<8x1xf32>
    %31 = math.rsqrt %30 : vector<8x1xf32>
    %32 = vector.broadcast %21 : vector<8x1xf32> to vector<8x32xf32>
    %33 = arith.subf %15, %32 : vector<8x32xf32>
    %34 = vector.broadcast %31 : vector<8x1xf32> to vector<8x32xf32>
    %35 = arith.mulf %33, %34 : vector<8x32xf32>
    %36 = vector.broadcast %16 : vector<1x32xf32> to vector<8x32xf32>
    %37 = arith.mulf %35, %36 : vector<8x32xf32>
    %38 = vector.broadcast %17 : vector<1x32xf32> to vector<8x32xf32>
    %39 = arith.addf %37, %38 : vector<8x32xf32>
    %40 = arith.truncf %39 : vector<8x32xf32> to vector<8x32xbf16>
    %cst_15 = arith.constant 0.000000e+00 : f32
    %41 = vector.broadcast %cst_15 : f32 to vector<8x32xf32>
    %c0_i32_16 = arith.constant 0 : i32
    %42 = arith.index_cast %c0_i32_16 : i32 to index
    %c0_17 = arith.constant 0 : index
    %c0_18 = arith.constant 0 : index
    %43 = vector.load %arg13[%42, %c0_17, %c0_18] : memref<1x32x64xbf16, #tpu.memory_space<vmem>>, vector<1x32x64xbf16>
    %44 = vector.shape_cast %43 : vector<1x32x64xbf16> to vector<32x64xbf16>
    %cst_19 = arith.constant dense<0.000000e+00> : vector<8x64xf32>
    %45 = tpu.matmul %40, %44, %cst_19 {dimension_numbers = #tpu.dot_dimension_numbers<[1], [0], [0], [1], [0, 0, 1, 1], [], []>} : vector<8x32xbf16>, vector<32x64xbf16>, vector<8x64xf32> -> vector<8x64xf32>
    %46 = arith.index_cast %c0_i32_16 : i32 to index
    %c0_20 = arith.constant 0 : index
    %c0_21 = arith.constant 0 : index
    %47 = vector.load %arg14[%46, %c0_20, %c0_21] : memref<1x1x64xf32, #tpu.memory_space<vmem>>, vector<1x1x64xf32>
    %48 = vector.shape_cast %47 : vector<1x1x64xf32> to vector<1x64xf32>
    %49 = vector.broadcast %48 : vector<1x64xf32> to vector<8x64xf32>
    %50 = arith.addf %45, %49 : vector<8x64xf32>
    %cst_22 = arith.constant 5.000000e-01 : f32
    %51 = vector.broadcast %cst_22 : f32 to vector<8x64xf32>
    %52 = arith.mulf %51, %50 : vector<8x64xf32>
    %cst_23 = arith.constant 0.707106769 : f32
    %53 = vector.broadcast %cst_23 : f32 to vector<8x64xf32>
    %54 = arith.mulf %50, %53 : vector<8x64xf32>
    %55 = math.erf %54 : vector<8x64xf32>
    %cst_24 = arith.constant 1.000000e+00 : f32
    %56 = vector.broadcast %cst_24 : f32 to vector<8x64xf32>
    %57 = arith.addf %56, %55 : vector<8x64xf32>
    %58 = arith.mulf %52, %57 : vector<8x64xf32>
    %59 = arith.truncf %58 : vector<8x64xf32> to vector<8x64xbf16>
    %60 = arith.index_cast %c0_i32_16 : i32 to index
    %c0_25 = arith.constant 0 : index
    %c0_26 = arith.constant 0 : index
    %61 = vector.load %arg15[%60, %c0_25, %c0_26] : memref<1x64x32xbf16, #tpu.memory_space<vmem>>, vector<1x64x32xbf16>
    %62 = vector.shape_cast %61 : vector<1x64x32xbf16> to vector<64x32xbf16>
    %cst_27 = arith.constant dense<0.000000e+00> : vector<8x32xf32>
    %63 = tpu.matmul %59, %62, %cst_27 {dimension_numbers = #tpu.dot_dimension_numbers<[1], [0], [0], [1], [0, 0, 1, 1], [], []>} : vector<8x64xbf16>, vector<64x32xbf16>, vector<8x32xf32> -> vector<8x32xf32>
    %64 = arith.addf %41, %63 : vector<8x32xf32>
    %c1_i32_28 = arith.constant 1 : i32
    %c0_29 = arith.constant 0 : index
    %c0_30 = arith.constant 0 : index
    %65 = vector.load %arg16[%c0_29, %c0_30] : memref<1x32xf32, #tpu.memory_space<vmem>>, vector<1x32xf32>
    %66 = vector.broadcast %65 : vector<1x32xf32> to vector<8x32xf32>
    %67 = arith.addf %64, %66 : vector<8x32xf32>
    %68 = arith.addf %67, %39 : vector<8x32xf32>
    %c0_31 = arith.constant 0 : index
    %c0_32 = arith.constant 0 : index
    %69 = vector.load %arg17[%c0_31, %c0_32] : memref<1x32xf32, #tpu.memory_space<vmem>>, vector<1x32xf32>
    %c0_33 = arith.constant 0 : index
    %c0_34 = arith.constant 0 : index
    %70 = vector.load %arg18[%c0_33, %c0_34] : memref<1x32xf32, #tpu.memory_space<vmem>>, vector<1x32xf32>
    %cst_35 = arith.constant dense<0.000000e+00> : vector<8xf32>
    %71 = vector.multi_reduction <add>, %68, %cst_35 [1] : vector<8x32xf32> to vector<8xf32>
    %72 = vector.shape_cast %71 : vector<8xf32> to vector<8x1xf32>
    %cst_36 = arith.constant 3.200000e+01 : f32
    %73 = vector.broadcast %cst_36 : f32 to vector<8x1xf32>
    %74 = arith.divf %72, %73 : vector<8x1xf32>
    %75 = vector.broadcast %74 : vector<8x1xf32> to vector<8x32xf32>
    %76 = arith.subf %68, %75 : vector<8x32xf32>
    %77 = arith.mulf %76, %76 : vector<8x32xf32>
    %cst_37 = arith.constant dense<0.000000e+00> : vector<8xf32>
    %78 = vector.multi_reduction <add>, %77, %cst_37 [1] : vector<8x32xf32> to vector<8xf32>
    %79 = vector.shape_cast %78 : vector<8xf32> to vector<8x1xf32>
    %cst_38 = arith.constant 3.200000e+01 : f32
    %80 = vector.broadcast %cst_38 : f32 to vector<8x1xf32>
    %81 = arith.divf %79, %80 : vector<8x1xf32>
    %cst_39 = arith.constant 9.99999996E-13 : f32
    %82 = vector.broadcast %cst_39 : f32 to vector<8x1xf32>
    %83 = arith.addf %81, %82 : vector<8x1xf32>
    %84 = math.rsqrt %83 : vector<8x1xf32>
    %85 = vector.broadcast %74 : vector<8x1xf32> to vector<8x32xf32>
    %86 = arith.subf %68, %85 : vector<8x32xf32>
    %87 = vector.broadcast %84 : vector<8x1xf32> to vector<8x32xf32>
    %88 = arith.mulf %86, %87 : vector<8x32xf32>
    %89 = vector.broadcast %69 : vector<1x32xf32> to vector<8x32xf32>
    %90 = arith.mulf %88, %89 : vector<8x32xf32>
    %91 = vector.broadcast %70 : vector<1x32xf32> to vector<8x32xf32>
    %92 = arith.addf %90, %91 : vector<8x32xf32>
    %c0_40 = arith.constant 0 : index
    %c0_41 = arith.constant 0 : index
    %c0_42 = arith.constant 0 : index
    %93 = vector.load %arg19[%c0_40, %c0_41, %c0_42] : memref<1x8x32xf32, #tpu.memory_space<vmem>>, vector<1x8x32xf32>
    %94 = vector.shape_cast %93 : vector<1x8x32xf32> to vector<8x32xf32>
    %95 = vector.shape_cast %92 : vector<8x32xf32> to vector<1x8x32xf32>
    tpu.vector_store %arg19[%c0_40, %c0_41, %c0_42], %95 {strides = array<i32>} : memref<1x8x32xf32, #tpu.memory_space<vmem>>, vector<1x8x32xf32>,
    return
  }
  func.func @transform_0(%arg0: i32, %arg1: i32) -> (i32, i32, i32) {
    %c0_i32 = arith.constant 0 : i32
    %c0_i32_0 = arith.constant 0 : i32
    %c0_i32_1 = arith.constant 0 : i32
    return %arg0, %c0_i32, %c0_i32_0 : i32, i32, i32
  }
  func.func @transform_1(%arg0: i32, %arg1: i32) -> (i32, i32, i32) {
    %c0_i32 = arith.constant 0 : i32
    %c0_i32_0 = arith.constant 0 : i32
    %c0_i32_1 = arith.constant 0 : i32
    %c0_i32_2 = arith.constant 0 : i32
    return %c0_i32, %c0_i32_0, %c0_i32_1 : i32, i32, i32
  }
  func.func @transform_2(%arg0: i32, %arg1: i32) -> (i32, i32, i32) {
    %c0_i32 = arith.constant 0 : i32
    %c0_i32_0 = arith.constant 0 : i32
    %c0_i32_1 = arith.constant 0 : i32
    %c0_i32_2 = arith.constant 0 : i32
    return %c0_i32, %c0_i32_0, %c0_i32_1 : i32, i32, i32
  }
  func.func @transform_3(%arg0: i32, %arg1: i32) -> (i32, i32, i32) {
    %c0_i32 = arith.constant 0 : i32
    %c0_i32_0 = arith.constant 0 : i32
    %c0_i32_1 = arith.constant 0 : i32
    %c0_i32_2 = arith.constant 0 : i32
    return %c0_i32, %c0_i32_0, %c0_i32_1 : i32, i32, i32
  }
  func.func @transform_4(%arg0: i32, %arg1: i32) -> (i32, i32, i32) {
    %c0_i32 = arith.constant 0 : i32
    %c0_i32_0 = arith.constant 0 : i32
    %c0_i32_1 = arith.constant 0 : i32
    %c0_i32_2 = arith.constant 0 : i32
    return %c0_i32, %c0_i32_0, %c0_i32_1 : i32, i32, i32
  }
  func.func @transform_5(%arg0: i32, %arg1: i32) -> (i32, i32, i32) {
    %c0_i32 = arith.constant 0 : i32
    %c0_i32_0 = arith.constant 0 : i32
    %c0_i32_1 = arith.constant 0 : i32
    %c0_i32_2 = arith.constant 0 : i32
    return %c0_i32, %c0_i32_0, %c0_i32_1 : i32, i32, i32
  }
  func.func @transform_6(%arg0: i32, %arg1: i32) -> (i32, i32, i32) {
    %c0_i32 = arith.constant 0 : i32
    %c0_i32_0 = arith.constant 0 : i32
    %c0_i32_1 = arith.constant 0 : i32
    %c0_i32_2 = arith.constant 0 : i32
    return %c0_i32, %c0_i32_0, %c0_i32_1 : i32, i32, i32
  }
  func.func @transform_7(%arg0: i32, %arg1: i32) -> (i32, i32, i32) {
    %c0_i32 = arith.constant 0 : i32
    %c0_i32_0 = arith.constant 0 : i32
    %c0_i32_1 = arith.constant 0 : i32
    %c0_i32_2 = arith.constant 0 : i32
    return %c0_i32, %c0_i32_0, %c0_i32_1 : i32, i32, i32
  }
  func.func @transform_8(%arg0: i32, %arg1: i32) -> (i32, i32) {
    %c0_i32 = arith.constant 0 : i32
    %c0_i32_0 = arith.constant 0 : i32
    %c0_i32_1 = arith.constant 0 : i32
    return %c0_i32, %c0_i32_0 : i32, i32
  }
  func.func @transform_9(%arg0: i32, %arg1: i32) -> (i32, i32) {
    %c0_i32 = arith.constant 0 : i32
    %c0_i32_0 = arith.constant 0 : i32
    %c0_i32_1 = arith.constant 0 : i32
    return %c0_i32, %c0_i32_0 : i32, i32
  }
  func.func @transform_10(%arg0: i32, %arg1: i32) -> (i32, i32) {
    %c0_i32 = arith.constant 0 : i32
    %c0_i32_0 = arith.constant 0 : i32
    %c0_i32_1 = arith.constant 0 : i32
    return %c0_i32, %c0_i32_0 : i32, i32
  }
  func.func @transform_11(%arg0: i32, %arg1: i32) -> (i32, i32, i32) {
    %c0_i32 = arith.constant 0 : i32
    %c0_i32_0 = arith.constant 0 : i32
    %c0_i32_1 = arith.constant 0 : i32
    %c0_i32_2 = arith.constant 0 : i32
    return %c0_i32, %c0_i32_0, %c0_i32_1 : i32, i32, i32
  }
  func.func @transform_12(%arg0: i32, %arg1: i32) -> (i32, i32, i32) {
    %c0_i32 = arith.constant 0 : i32
    %c0_i32_0 = arith.constant 0 : i32
    %c0_i32_1 = arith.constant 0 : i32
    %c0_i32_2 = arith.constant 0 : i32
    return %c0_i32, %c0_i32_0, %c0_i32_1 : i32, i32, i32
  }
  func.func @transform_13(%arg0: i32, %arg1: i32) -> (i32, i32, i32) {
    %c0_i32 = arith.constant 0 : i32
    %c0_i32_0 = arith.constant 0 : i32
    %c0_i32_1 = arith.constant 0 : i32
    %c0_i32_2 = arith.constant 0 : i32
    return %c0_i32, %c0_i32_0, %c0_i32_1 : i32, i32, i32
  }
  func.func @transform_14(%arg0: i32, %arg1: i32) -> (i32, i32) {
    %c0_i32 = arith.constant 0 : i32
    %c0_i32_0 = arith.constant 0 : i32
    %c0_i32_1 = arith.constant 0 : i32
    return %c0_i32, %c0_i32_0 : i32, i32
  }
  func.func @transform_15(%arg0: i32, %arg1: i32) -> (i32, i32) {
    %c0_i32 = arith.constant 0 : i32
    %c0_i32_0 = arith.constant 0 : i32
    %c0_i32_1 = arith.constant 0 : i32
    return %c0_i32, %c0_i32_0 : i32, i32
  }
  func.func @transform_16(%arg0: i32, %arg1: i32) -> (i32, i32) {
    %c0_i32 = arith.constant 0 : i32
    %c0_i32_0 = arith.constant 0 : i32
    %c0_i32_1 = arith.constant 0 : i32
    return %c0_i32, %c0_i32_0 : i32, i32
  }
  func.func @transform_17(%arg0: i32, %arg1: i32) -> (i32, i32, i32) {
    %c0_i32 = arith.constant 0 : i32
    %c0_i32_0 = arith.constant 0 : i32
    return %arg0, %arg1, %c0_i32 : i32, i32, i32
  }
}

</mosaic_0001>

<bundles_post_ra>
// kernel: tpu_custom_call.1
= control target key start
LH: loop header
LB: loop body
LE: loop exit
PB: predicated region body
PF: predicated region fallthrough
CT: control target
= control target key end

     0   :  { %s2020_s0 = inlined_call_operand.vmem [shape: f32[2,8,32], index: 0, kind: input, shape index: {}]   ;;  %s2021_s1 = inlined_call_operand.vmem [shape: bf16[2,32,16], index: 1, kind: input, shape index: {}]   ;;  %s2022_s2 = inlined_call_operand.vmem [shape: f32[2,1,16], index: 2, kind: input, shape index: {}]   ;;  %s2023_s3 = inlined_call_operand.vmem [shape: bf16[2,32,16], index: 3, kind: input, shape index: {}]   ;;  %s2024_s4 = inlined_call_operand.vmem [shape: f32[2,1,16], index: 4, kind: input, shape index: {}]   ;;  %s2025_s5 = inlined_call_operand.vmem [shape: bf16[2,32,16], index: 5, kind: input, shape index: {}]   ;;  %s2026_s6 = inlined_call_operand.vmem [shape: f32[2,1,16], index: 6, kind: input, shape index: {}]   ;;  %s2027_s7 = inlined_call_operand.vmem [shape: bf16[2,16,32], index: 7, kind: input, shape index: {}]   ;;  %s2028_s8 = inlined_call_operand.vmem [shape: f32[1,32], index: 8, kind: input, shape index: {}]   ;;  %s2029_s9 = inlined_call_operand.vmem [shape: f32[1,32], index: 9, kind: input, shape index: {}]   ;;  %s2030_s10 = inlined_call_operand.vmem [shape: f32[1,32], index: 10, kind: input, shape index: {}]   ;;  %s2031_s11 = inlined_call_operand.vmem [shape: bf16[1,32,64], index: 11, kind: input, shape index: {}]   ;;  %s2032_s12 = inlined_call_operand.vmem [shape: f32[1,1,64], index: 12, kind: input, shape index: {}]   ;;  %s2033_s13 = inlined_call_operand.vmem [shape: bf16[1,64,32], index: 13, kind: input, shape index: {}]   ;;  %s2034_s14 = inlined_call_operand.vmem [shape: f32[1,32], index: 14, kind: input, shape index: {}]   ;;  %s2035_s15 = inlined_call_operand.vmem [shape: f32[1,32], index: 15, kind: input, shape index: {}]   ;;  %s2036_s16 = inlined_call_operand.vmem [shape: f32[1,32], index: 16, kind: input, shape index: {}]   ;;  %s2037_s17 = inlined_call_operand.hbm [shape: f32[2,8,32], index: 17, kind: output, shape index: {}]  }
   0x1   :  { %2043 = sst [smem:[#allocation12_spill]] %s2020_s0 }
   0x2   :  { %2044 = sst [smem:[#allocation13_spill]] %s2021_s1 }
   0x3   :  { %2045 = sst [smem:[#allocation14_spill]] %s2023_s3 }
   0x4   :  { %22 = vsyncpa [#allocation5], 0 }
   0x5   :  { %24 = vsyncpa [#allocation5 + $0x1], 0  ;;  %s1774_s24 = smov 0   ;;  %s1776_s25 = smov 0  }
   0x6   :  { %s1778_s26 = smov 0   ;;  %s1780_s27 = smov 0  }
   0x7   :  { %s1782_s28 = smov 0   ;;  %s1784_s29 = smov 0  }
   0x8 LB: > { %2046 = sst [smem:[#allocation7_spill]] %s1643_s24  ;;  %s1321_s0 = sadd.s32 4294967295, %s1663_s29   ;;  %s1663_s29 = sphi %s1784_s29, %s30_s29   ;;  %s1659_s28 = sphi %s1782_s28, %s2064_s28   ;;  %s1655_s27 = sphi %s1780_s27, %s2063_s27   ;;  %s1651_s26 = sphi %s1778_s26, %s2067_s26   ;;  %s1647_s25 = sphi %s1776_s25, %s2066_s25   ;;  %s1643_s24 = sphi %s1774_s24, %s2065_s24  }
   0x9   : > { %2047 = sst [smem:[#allocation8_spill]] %s1659_s28  ;;  %s1322_s30 = sadd.s32 4294967294, %s1663_s29  }
   0xa   : > { %s42_s18 = sadd.s32 1, %s1659_s28  ;;  %s413_s19 = sadd.s32 1, %s1651_s26 }
   0xb   : > { %p44_p0 = scmp.ge.s32.totalorder %s42_s18, 2  ;;  %p423_p1 = scmp.ne.s32.totalorder %s1651_s26, %s1647_s25 }
   0xc   : > { %p424_p2 = scmp.eq.s32.totalorder %s1321_s0, 1  ;;  %p429_p3 = scmp.ne.s32.totalorder %s1647_s25, %s1643_s24 }
   0xd   : > { %s2069_s18 = smov (%p44_p0, %s42_s18), 0  ;;  %p430_p5 = scmp.eq.s32.totalorder %s1322_s30, 1 }
   0xe   : > { %2048 = sst [smem:[#allocation9_spill]] %s2069_s18  ;;  %p1814_p4 = por %p424_p2, %p423_p1 }
   0xf   : > { %s408_s20 = ssub.s32 %s1659_s28, %s2069_s18  ;;  %p1325_p6 = scmp.ge.s32.totalorder %s1663_s29, 1 }
  0x10   : > { %p411_p7 = scmp.eq.s32.totalorder %s408_s20, 0  ;;  %p1821_p8 = por %p430_p5, %p429_p3 }
  0x11   : > { %p503_p9 = scmp.lt.s32.totalorder %s1663_s29, 3 }
  0x12   : > { %s2050_s21 = scalar_select %p1821_p8, 1, 0 }
  0x13   : > { %s1827_s22 = scalar_select %p411_p7, %s1651_s26, %s413_s19  }
  0x14   : > { %2051 = sst [smem:[#allocation10_spill]] %s2050_s21  ;;  %p504_p10 = pnand %p1325_p6, %p503_p9 }
  0x15   : > { %2052 = sst [smem:[#allocation11_spill]] %s1827_s22  ;;  %s2042_s23 = sand.u32 (!%p504_p10), 1, %s1647_s25  }
  0x16   : > { %507 = sbr.rel (%p504_p10) target bundleno = 2399 (0x95f), region = 88  ;;  %p554_p11 = scmp.lt.s32.totalorder (!%p504_p10), %s1655_s27, 1 }
  0x17   : > { %s1833_s0 = sshll.u32 (!%p504_p10), %s2042_s23, 3  ;;  %s2053_s21 = sld [smem:[#allocation12_spill]] (!%p504_p10) }
  0x18   : > { %s1843_s22 = smov (!%p504_p10), 0  }
  0x1d   : > { %s555_s30 = scalar_select %p554_p11, %s1655_s27, 1 }
  0x1f   : > { %s1327_s20 = sshll.u32 %s555_s30, 3 }
  0x20   : > { %s1839_s24 = scalar_lea.vmem %s2053_s21, %s1327_s20 }
  0x21   : > { %v563_v0 = vld [vmem:[%s1839_s24] sm:$0xff] }
  0x22   : > { %v564_v1 = vpack.c.bf16 %v563_v0, %v563_v0 }
  0x23 LB: >> { %v1677_v2 = vmov 0.0   ;;  %s1374_s30 = sshll.u32 %s1667_s22, 4  ;;  %vm1678_vm0 = vmmov 0   ;;  %s2054_s3 = sld [smem:[#allocation14_spill]]  ;;  %vm598_vm1 = vcmask 261120   ;;  %vm711_vm2 = vcmask 125952   ;;  %s1667_s22 = sphi %s1843_s22, %s570_s22  }
  0x24   : >> { %1401 = vmatprep.subr.bf16.mxu0 %v1677_v2  ;;  %1409 = vmatprep.subr.bf16.mxu1 %v1677_v2  ;;  %s643_s19 = scalar_lea.vmem %s2025_s5, %s1374_s30 }
  0x25   : >> { %1405 = vmatprep.mubr.msk.bf16.mxu0 %vm1678_vm0, %v1677_v2  ;;  %1413 = vmatprep.mubr.msk.bf16.mxu1 %vm1678_vm0, %v1677_v2  ;;  %v1549_v4 = vld [vmem:[%s643_s19] sm:$0xff]   ;;  %v1551_v6 = vld [vmem:[%s643_s19 + $0x8] sm:$0xff]  }
  0x26   : >> { %1410 = vmatpush3.bf16.msra.mxu1 %v1549_v4 }
  0x27   : >> { %1411 = vmatprep.subr.bf16.mxu1 %v1677_v2 }
  0x29   : >> { %s573_s21 = scalar_lea.vmem %s2054_s3, %s1374_s30  ;;  %s578_s30 = scalar_lea.vmem %s2024_s4, %s1667_s22 }
  0x2a   : >> { %v1548_v3 = vld [vmem:[%s573_s21] sm:$0xff]   ;;  %v1550_v5 = vld [vmem:[%s573_s21 + $0x8] sm:$0xff]   ;;  %1412 = vmatpush3.bf16.msra.mxu1 %v1551_v6  ;;  %s648_s3 = scalar_lea.vmem %s2026_s6, %s1667_s22  ;;  %s1339_s21 = sshll.u32 %s1667_s22, 2 }
  0x2b   : >> { %1402 = vmatpush3.bf16.msra.mxu0 %v1548_v3  ;;  %v1330_v7 = vld [vmem:[%s578_s30] ss:$0 sm:$0xff]  ;;  %s710_s19 = scalar_lea.vmem [#allocation2], %s1339_s21  ;;  %s715_s28 = scalar_lea.vmem [#allocation3], %s1339_s21 }
  0x2c   : >> { %1403 = vmatprep.subr.bf16.mxu0 %v1677_v2  ;;  %v1335_v8 = vld [vmem:[%s648_s3] ss:$0 sm:$0xff]  ;;  %s570_s22 = sadd.s32 1, %s1667_s22  }
  0x2d   : >> { %1414 = vmatmul.mubr.msk.bf16.vlgmr.msra.gmra.mrb[0].mxu1 %vm598_vm1, %v564_v1  ;;  %p567_p12 = scmp.ge.s32.totalorder %s570_s22, 2  }
  0x2e   : > { %v1870_v21 = vld [vmem:[%s1839_s24] sm:$0xff] (%p567_p12)  ;;  %v1874_v23 = vmov (%p567_p12), 0.0   ;;  %s1876_s3 = smov (%p567_p12), 0  }
  0x2f   : >> { %1404 = vmatpush3.bf16.msra.mxu0 %v1550_v5  ;;  %v720_v22 = vpack.c.bf16 (%p567_p12), %v1870_v21, %v1870_v21 }
  0x32   : >> { %1406 = vmatmul.mubr.msk.bf16.vlgmr.msra.gmra.mrb[0].mxu0 %vm598_vm1, %v564_v1 }
 0x100   : >> { %v702_v11 = vpop.f32.mrb[0].mxu1 }
 0x101   : >> { %v703_v13 = vadd.f32 %v1335_v8, %v702_v11  ;;  %v1415_v14 = vpop.f32.mrb[1].mxu1 }
 0x102   : >> { %v705_v17 = vpop.f32.mrb[2].mxu1 }
 0x103   : >> { %v713_v19 = vpack.c.bf16 %v703_v13, %v703_v13  ;;  %v1416_v20 = vpop.f32.mrb[3].mxu1 }
 0x104   : > { %569 = sbr.rel (!%p567_p12) target bundleno = 35 (0x23), region = 153 }
 0x105   : >> { %v636_v9 = vpop.f32.mrb[0].mxu0  ;;  %716 = vst.msk [vmem:[%s715_s28] sm:$0xf] %vm711_vm2, %v713_v19 }
 0x106   : >> { %v637_v10 = vadd.f32 %v1330_v7, %v636_v9  ;;  %v1407_v12 = vpop.f32.mrb[1].mxu0 }
 0x107   : >> { %v639_v15 = vpop.f32.mrb[2].mxu0 }
 0x108   : >> { %v708_v16 = vpack.c.bf16 %v637_v10, %v637_v10  ;;  %v1408_v18 = vpop.f32.mrb[3].mxu0 }
 0x10a   : >> { %712 = vst.msk [vmem:[%s710_s19] sm:$0xf] %vm711_vm2, %v708_v16 }
 0x10b LB: >> { %v1679_v24 = vmov 0.0   ;;  %vm1680_vm3 = vmmov 0   ;;  %s1376_s24 = sshll.u32 %s1675_s3, 4  ;;  %s2055_s30 = sld [smem:[#allocation13_spill]]  ;;  %vm808_vm4 = vcmask 130048   ;;  %vm855_vm5 = vcmask 64512   ;;  %s1675_s3 = sphi %s1876_s3, %s726_s3   ;;  %v1671_v23 = vphi %v1874_v23, %v2056_v23  }
 0x10c   : >> { %1417 = vmatprep.subr.bf16.mxu0 %v1679_v24  ;;  %1421 = vmatprep.mubr.msk.bf16.mxu0 %vm1680_vm3, %v1679_v24  ;;  %s1347_s20 = sshll.u32 %s1675_s3, 2  ;;  %vm874_vm6 = vcmask 1043456   ;;  %s1377_s23 = sshll.u32 %s1675_s3, 3 }
 0x10d   : >> { %1425 = vmatprep.subr.bf16.mxu1 %v1679_v24  ;;  %1427 = vmatprep.mubr.msk.bf16.mxu1 %vm1680_vm3, %v1679_v24  ;;  %s803_s21 = scalar_lea.vmem [#allocation2], %s1347_s20  ;;  %s806_s22 = scalar_lea.vmem [#allocation3], %s1347_s20 }
 0x10e   : >> { %v807_v42 = vld [vmem:[%s806_s22] sm:$0xf]  ;;  %s924_s20 = scalar_lea.vmem %s2027_s7, %s1377_s23 }
 0x10f   : >> { %v876_v43 = vsel %vm874_vm6, %v807_v42, 0  ;;  %v1554_v50 = vld [vmem:[%s924_s20] sm:$0xff]  }
 0x111   : >> { %s730_s18 = scalar_lea.vmem %s2055_s30, %s1376_s24  ;;  %v804_v27 = vld [vmem:[%s803_s21] sm:$0xf]  ;;  %s735_s24 = scalar_lea.vmem %s2022_s2, %s1675_s3 }
 0x112   : >> { %v1552_v25 = vld [vmem:[%s730_s18] sm:$0xff]   ;;  %v1553_v26 = vld [vmem:[%s730_s18 + $0x8] sm:$0xff]   ;;  %v813_v28 = vsel %vm808_vm4, %v804_v27, 0  ;;  %s726_s3 = sadd.s32 1, %s1675_s3  }
 0x113   : >> { %1418 = vmatpush3.bf16.msra.mxu0 %v1552_v25  ;;  %1426 = vmatpush3.bf16.xpose.msra.mxu1 %v813_v28  ;;  %v1343_v29 = vld [vmem:[%s735_s24] ss:$0 sm:$0xff]  ;;  %p723_p13 = scmp.ge.s32.totalorder %s726_s3, 2  }
 0x114   : >> { %1419 = vmatprep.subr.bf16.mxu0 %v1679_v24  ;;  %1437 = vmatprep.subr.bf16.mxu1 %v1679_v24  ;;  %v1355_v6 = vld [vmem:[%s2028_s8] ss:$0 sm:$0xff] (%p723_p13)  ;;  %v1681_v16 = vmov (%p723_p13), 0.0   ;;  %vm1682_vm7 = vmmov (%p723_p13), 0   ;;  %v1562_v17 = vld [vmem:[%s2031_s11 + $0x8] sm:$0xff] (%p723_p13)   ;;  %vm1129_vm8 = vcmask (%p723_p13), 523264  }
 0x115   : > { %v1561_v15 = vld [vmem:[%s2031_s11] sm:$0xff] (%p723_p13)   ;;  %s1371_s23 = sshll.u32 (%p723_p13), %s1655_s27, 7  ;;  %s2057_s30 = scalar_lea.vmem (%p723_p13), [#allocation4], %s1833_s0 }
 0x116   : > { %v1563_v28 = vld [vmem:[%s2033_s13] sm:$0xff] (%p723_p13)   ;;  %s1219_s18 = sshll.u32 (%p723_p13), %s2057_s30, 4  ;;  %s1968_s19 = scalar_lea.hbm (%p723_p13), %s2037_s17, %s1371_s23  ;;  %s1970_s18 = int_to_ptr.vmem [resolvable:$true] %s1219_s18 }
 0x117   : >> { %1420 = vmatpush3.bf16.msra.mxu0 %v1553_v26  ;;  %s2058_s28 = smov (%p723_p13), %s2057_s30  ;;  %s2059_s3 = sand.u32 (%p723_p13), 1, %s1647_s25  }
 0x118   : >> { %1431 = vmatprep.subr.bf16.mxu0 %v1679_v24  ;;  %s1205_s24 = scalar_lea.sflag (%p723_p13), [#allocation5], %s2059_s3  ;;  %s1573_s27 = scalar_lea.vmem (%p723_p13), %s1970_s18, 128 }
 0x119   : > { %p1574_p0 = scmp.ne.s32.totalorder (%p723_p13), %s1970_s18, %s1573_s27  ;;  %s1683_s22 = smov (%p723_p13), [#allocation4]  }
 0x11a   : >> { %1422 = vmatmul.mubr.msk.bf16.vlgmr.msra.gmra.mrb[0].mxu0 %vm598_vm1, %v720_v22  ;;  %v1356_v22 = vld [vmem:[%s2029_s9] ss:$0 sm:$0xff] (%p723_p13)  ;;  %s1577_s30 = sshll.u32 (%p723_p13), %s1683_s22, 4  ;;  %s1578_s30 = int_to_ptr.vmem [resolvable:$false] %s1577_s30 }
 0x11b   : >> { %1433 = vmatprep.mubr.msk.bf16.mxu0 %vm1680_vm3, %v1679_v24  ;;  %1432 = vmatpush3.bf16.msra.mxu0 %v876_v43  ;;  %p1575_p1 = pnand (%p723_p13), %p1574_p0, %p1814_p4  ;;  %s1579_s23 = scalar_lea.vmem (%p723_p13), %s1578_s30, 256 }
 0x11c   : > { %1443 = vmatprep.subr.bf16.mxu0 (%p723_p13), %v1681_v16  ;;  %p1580_p3 = scmp.lt.s32.totalorder (%p723_p13), %s1970_s18, %s1578_s30  ;;  %p1581_p5 = scmp.lt.s32.totalorder (%p723_p13), %s1579_s23, %s1573_s27 }
 0x11d   : > { %p1576_p2 = pneg (%p723_p13), %p1575_p1 }
 0x11e   : > { %p1582_p6 = por (%p723_p13), %p1581_p5, %p1580_p3 }
 0x120   : > { %p1583_p7 = pnand (%p723_p13), %p1582_p6, %p1576_p2 }
 0x1ed   : >> { %v793_v30 = vpop.f32.mrb[0].mxu0 }
 0x1ee   : >> { %v794_v31 = vadd.f32 %v1343_v29, %v793_v30  ;;  %v1423_v32 = vpop.f32.mrb[1].mxu0  ;;  %v1564_v29 = vld [vmem:[%s2033_s13 + $0x8] sm:$0xff] (%p723_p13)   ;;  %v1565_v30 = vld [vmem:[%s2033_s13 + $0x10] sm:$0xff] (%p723_p13)  }
 0x1ef   : >> { %v796_v33 = vpop.f32.mrb[2].mxu0  ;;  %v1358_v32 = vld [vmem:[%s2032_s12] ss:$0 sm:$0xff] (%p723_p13) }
 0x1f0   : >> { %v799_v34 = vmul.f32 0.25, %v794_v31  ;;  %v1424_v35 = vpop.f32.mrb[3].mxu0  ;;  %v1566_v31 = vld [vmem:[%s2033_s13 + $0x18] sm:$0xff] (%p723_p13)  }
 0x1f2   : >> { %v800_v36 = vpack.c.bf16 %v799_v34, %v799_v34 }
 0x1f4   : >> { %1428 = vmatmul.mubr.msk.bf16.vlgmr.msra.gmra.mrb[0].mxu1 %vm808_vm4, %v800_v36 }
 0x1f5   : >> { %1439 = vmatprep.mubr.msk.bf16.mxu1 %vm1680_vm3, %v1679_v24  ;;  %1438 = vmatpush3.bf16.msra.mxu1 %v1554_v50  ;;  %v1357_v24 = vld [vmem:[%s2030_s10] ss:$0 sm:$0xff] (%p723_p13) }
 0x1f6   : > { %1451 = vmatprep.subr.bf16.mxu1 (%p723_p13), %v1681_v16 }
 0x2c7   : >> { %v849_v37 = vpop.f32.mrb[0].mxu1 }
 0x2c8   : >> { %v1429_v38 = vpop.f32.mrb[1].mxu1  ;;  %v856_v39 = vsel %vm855_vm5, %v849_v37, -inf }
 0x2c9   : >> { %857 = vmax.xlane.f32.xlu0 %v856_v39  ;;  %v852_v40 = vpop.f32.mrb[2].mxu1 }
 0x2ca   : >> { %v1430_v41 = vpop.f32.mrb[3].mxu1 }
 0x356   : >> { %v858_v44 = vpop.xlane.xlu0 %857 }
 0x357   : >> { %v862_v45 = vsub.f32 %v849_v37, %v858_v44  ;;  %v859_v51 = vsub.f32 -inf, %v858_v44  ;;  %v1362_v44 = vld [vmem:[%s2034_s14] ss:$0 sm:$0xff] (%p723_p13) }
 0x359   : >> { %v863_v46 = vmul.f32 1.442695, %v862_v45  ;;  %v860_v52 = vmul.f32 1.442695, %v859_v51 }
 0x35b   : >> { %1555 = vpow2.f32 %v863_v46 }
 0x35c   : >> { %1557 = vpow2.f32 %v860_v52 }
 0x365   : >> { %v1556_v47 = vpop.eup %1555 }
 0x366   : >> { %v866_v48 = vsel %vm855_vm5, %v1556_v47, 0.0  ;;  %v870_v49 = vpack.c.bf16 %v1556_v47, %v1556_v47  ;;  %v1558_v53 = vpop.eup %1557 }
 0x367   : >> { %867 = vadd.xlane.f32.xlu0 %v866_v48  ;;  %v865_v55 = vmul.f32 0.0, %v1558_v53 }
 0x368   : >> { %1434 = vmatmul.mubr.msk.bf16.vlgmr.msra.gmra.mrb[4].mxu0 %vm855_vm5, %v870_v49 }
 0x369   : > { %1447 = vmatprep.mubr.msk.bf16.mxu0 (%p723_p13), %vm1682_vm7, %v1681_v16  ;;  %1444 = vmatpush3.bf16.msra.mxu0 (%p723_p13), %v1561_v15 }
 0x36a   : > { %1445 = vmatprep.subr.bf16.mxu0 (%p723_p13), %v1681_v16 }
 0x36d   : > { %1446 = vmatpush3.bf16.msra.mxu0 (%p723_p13), %v1562_v17 }
 0x3f4   : >> { %v868_v54 = vpop.xlane.xlu0 %867 }
 0x3f5   : >> { %v869_v56 = vadd.f32 %v868_v54, %v865_v55 }
 0x3f7   : >> { %1559 = vrcp.f32 %v869_v56 }
 0x401   : >> { %v1560_v60 = vpop.eup %1559 }
 0x43b   : >> { %v912_v57 = vpop.f32.mrb[4].mxu0 }
 0x43c   : >> { %v918_v58 = vadd.f32 %v912_v57, %v865_v55  ;;  %v1435_v59 = vpop.f32.mrb[5].mxu0 }
 0x43d   : >> { %v915_v61 = vpop.f32.mrb[6].mxu0 }
 0x43e   : >> { %v920_v62 = vmul.f32 %v1560_v60, %v918_v58  ;;  %v1436_v63 = vpop.f32.mrb[7].mxu0  ;;  %v1368_v61 = vld [vmem:[%s2035_s15] ss:$0 sm:$0xff] (%p723_p13) }
 0x43f   : > { %v1369_v63 = vld [vmem:[%s2036_s16] ss:$0 sm:$0xff] (%p723_p13) }
 0x440   : >> { %v921_v0 = vpack.c.bf16 %v920_v62, %v920_v62 }
 0x442   : >> { %1440 = vmatmul.mubr.msk.bf16.vlgmr.msra.gmra.mrb[4].mxu1 %vm808_vm4, %v921_v0 }
 0x443   : > { %1459 = vmatprep.mubr.msk.bf16.mxu1 (%p723_p13), %vm1682_vm7, %v1681_v16  ;;  %1452 = vmatpush3.bf16.msra.mxu1 (%p723_p13), %v1563_v28 }
 0x444   : > { %1453 = vmatprep.subr.bf16.mxu1 (%p723_p13), %v1681_v16 }
 0x447   : > { %1454 = vmatpush3.bf16.msra.mxu1 (%p723_p13), %v1564_v29 }
 0x448   : > { %1455 = vmatprep.subr.bf16.mxu1 (%p723_p13), %v1681_v16 }
 0x44b   : > { %1456 = vmatpush3.bf16.msra.mxu1 (%p723_p13), %v1565_v30 }
 0x44c   : > { %1457 = vmatprep.subr.bf16.mxu1 (%p723_p13), %v1681_v16 }
 0x44f   : > { %1458 = vmatpush3.bf16.msra.mxu1 (%p723_p13), %v1566_v31 }
 0x512   : > { %725 = sbr.rel (!%p723_p13) target bundleno = 267 (0x10b), region = 164 }
 0x515   : >> { %v970_v1 = vpop.f32.mrb[4].mxu1 }
 0x516   : >> { %v976_v2 = vadd.f32 %v1671_v23, %v970_v1   ;;  %v1441_v3 = vpop.f32.mrb[5].mxu1 }
 0x517   : >> { %v973_v4 = vpop.f32.mrb[6].mxu1 }
 0x518   : >> { %v1442_v5 = vpop.f32.mrb[7].mxu1  ;;  %v2056_v23 = vmov %v976_v2  ;;  %v984_v7 = vadd.f32 (%p723_p13), %v1355_v6, %v976_v2 }
 0x51a   : > { %v985_v8 = vadd.f32 %v984_v7, %v1870_v21 }
 0x51c   : > { %v989_v9 = vsel %vm598_vm1, %v985_v8, 0.0 }
 0x51d   : > { %990 = vadd.xlane.f32.xlu0 %v989_v9 }
 0x5aa   : > { %v991_v10 = vpop.xlane.xlu0 %990 }
 0x5ab   : > { %v993_v11 = vmul.f32 0.03125, %v991_v10 }
 0x5ad   : > { %v994_v12 = vsub.f32 %v985_v8, %v993_v11 }
 0x5af   : > { %v995_v13 = vmul.f32 %v994_v12, %v994_v12 }
 0x5b1   : > { %v996_v14 = vsel %vm598_vm1, %v995_v13, 0.0 }
 0x5b2   : > { %997 = vadd.xlane.f32.xlu0 %v996_v14 }
 0x63f   : > { %v998_v18 = vpop.xlane.xlu0 %997 }
 0x640   : > { %v999_v19 = vmul.f32 0.03125, %v998_v18 }
 0x642   : > { %v1000_v20 = vadd.f32 1e-12, %v999_v19 }
 0x644   : > { %1567 = vrsqrt.f32 %v1000_v20 }
 0x64e   : > { %v1568_v21 = vpop.eup %1567 }
 0x64f   : > { %v1002_v23 = vmul.f32 %v1568_v21, %v994_v12 }
 0x651   : > { %v1009_v25 = vmul.f32 %v1356_v22, %v1002_v23 }
 0x653   : > { %v1016_v26 = vadd.f32 %v1357_v24, %v1009_v25 }
 0x655   : > { %v1017_v27 = vpack.c.bf16 %v1016_v26, %v1016_v26 }
 0x657   : > { %1448 = vmatmul.mubr.msk.bf16.vlgmr.msra.gmra.mrb[0].mxu0 %vm598_vm1, %v1017_v27 }
 0x72a   : > { %v1078_v33 = vpop.f32.mrb[0].mxu0 }
 0x72b   : > { %v1079_v34 = vadd.f32 %v1358_v32, %v1078_v33  ;;  %v1449_v35 = vpop.f32.mrb[1].mxu0 }
 0x72c   : > { %v1081_v36 = vpop.f32.mrb[2].mxu0 }
 0x72d   : > { %v1085_v37 = vmul.f32 0.70710677, %v1079_v34  ;;  %v1450_v38 = vpop.f32.mrb[3].mxu0  ;;  %v1084_v40 = vmul.f32 0.5, %v1079_v34 }
 0x72f   : > { %1569 = verf.f32 %v1085_v37 }
 0x739   : > { %v1570_v39 = vpop.eup %1569 }
 0x73a   : > { %v1087_v41 = vadd.f32 1.0, %v1570_v39 }
 0x73c   : > { %v1088_v42 = vmul.f32 %v1087_v41, %v1084_v40 }
 0x73e   : > { %v1089_v43 = vpack.c.bf16 %v1088_v42, %v1088_v42 }
 0x740   : > { %1460 = vmatmul.mubr.msk.bf16.vlgmr.msra.gmra.mrb[0].mxu1 %vm1129_vm8, %v1089_v43 }
 0x813   : > { %v1167_v45 = vpop.f32.mrb[0].mxu1 }
 0x814   : > { %v1168_v46 = vadd.f32 %v1362_v44, %v1167_v45  ;;  %v1461_v47 = vpop.f32.mrb[1].mxu1 }
 0x815   : > { %v1170_v48 = vpop.f32.mrb[2].mxu1 }
 0x816   : > { %v1462_v49 = vpop.f32.mrb[3].mxu1  ;;  %v1173_v50 = vadd.f32 %v1168_v46, %v1016_v26 }
 0x818   : > { %v1176_v51 = vsel %vm598_vm1, %v1173_v50, 0.0 }
 0x819   : > { %1177 = vadd.xlane.f32.xlu1 %v1176_v51 }
 0x8a6   : > { %v1178_v52 = vpop.xlane.xlu1 %1177 }
 0x8a7   : > { %v1179_v53 = vmul.f32 0.03125, %v1178_v52 }
 0x8a9   : > { %v1180_v54 = vsub.f32 %v1173_v50, %v1179_v53 }
 0x8ab   : > { %v1181_v55 = vmul.f32 %v1180_v54, %v1180_v54 }
 0x8ad   : > { %v1182_v56 = vsel %vm598_vm1, %v1181_v55, 0.0 }
 0x8ae   : > { %1183 = vadd.xlane.f32.xlu1 %v1182_v56 }
 0x93b   : > { %v1184_v57 = vpop.xlane.xlu1 %1183 }
 0x93c   : > { %v1185_v58 = vmul.f32 0.03125, %v1184_v57 }
 0x93e   : > { %v1186_v59 = vadd.f32 1e-12, %v1185_v58 }
 0x940   : > { %1571 = vrsqrt.f32 %v1186_v59 }
 0x94a   : > { %v1572_v60 = vpop.eup %1571 }
 0x94b   : > { %v1188_v62 = vmul.f32 %v1572_v60, %v1180_v54 }
 0x94d   : > { %v1195_v0 = vmul.f32 %v1368_v61, %v1188_v62 }
 0x94f   : > { %v1202_v1 = vadd.f32 %v1369_v63, %v1195_v0 }
 0x951   : > { %1203 = vst.msk [vmem:[%s2058_s28] sm:$0xff] %vm598_vm1, %v1202_v1 }
 0x952   : > { %1586 = shalt.err (!%p1583_p7)
}
 0x953   : > { %s1587_s0 = scalar_lea.hbm %s1968_s19, 128  ;;  %s1591_s28 = scalar_lea.hbm %s2037_s17, 256 }
 0x954   : > { %p1588_p9 = scmp.ne.s32.totalorder %s1968_s19, %s1587_s0  ;;  %p1592_p12 = scmp.lt.u32.totalorder %s1968_s19, %s2037_s17 }
 0x955   : > { %p1593_p13 = scmp.lt.u32.totalorder %s1591_s28, %s1587_s0  ;;  %p1595_p1 = scmp.lt.u32.totalorder %s1587_s0, %s1968_s19 }
 0x956   : > { %p1589_p10 = pnand %p1588_p9, %p1814_p4 }
 0x957   : > { %p1594_p0 = por %p1593_p13, %p1592_p12 }
 0x958   : > { %p1590_p11 = pneg %p1589_p10 }
 0x959   : > { %p1596_p2 = por %p1595_p1, %p1594_p0 }
 0x95b   : > { %p1597_p3 = pnand %p1596_p2, %p1590_p11 }
 0x95d   : > { %1600 = shalt.err (!%p1597_p3)
}
 0x95e   : > { %1463 = dma.vmem_to_hbm [thread:$0]  (%p1814_p4), %s1970_s18, 128, %s1968_s19, %s1205_s24  }
 0x95f PF: > { %s2060_s27 = sld [smem:[#allocation7_spill]]  ;;  %p1469_p5 = scmp.ge.s32.totalorder %s1663_s29, 2 }
 0x961   : > { %p1466_p6 = pnand %p1469_p5, %p1821_p8 }
 0x965   : > { %s1231_s23 = sand.u32 1, %s2060_s27  }
 0x966   : > { %s1232_s20 = scalar_lea.sflag [#allocation5], %s1231_s23 }
 0x967   : > { %1638 = dma.done.wait (!%p1466_p6), %s1232_s20, 128  }
 0x968   : > { %1640 = vsyncadd (!%p1466_p6), %s1232_s20, 4294967168  ;;  %s30_s29 = sadd.s32 1, %s1663_s29   ;;  %s2062_s1 = sld [smem:[#allocation11_spill]] }
 0x969   : > { %p27_p7 = scmp.ge.s32.totalorder %s30_s29, 4   ;;  %s2063_s27 = sld [smem:[#allocation8_spill]] }
 0x96a   : > { %s2064_s28 = sld [smem:[#allocation9_spill]]  ;;  %s2065_s24 = smov %s1647_s25 }
 0x96b   : > { %s2066_s25 = smov %s1651_s26  ;;  %29 = sbr.rel (!%p27_p7) target bundleno = 8 (0x8), region = 175 }
 0x96e   : > { %s2067_s26 = smov %s2062_s1 }
 0x972   :  { %1237 = vsyncpa [#allocation5], 1 }
 0x973   :  { %1239 = vsyncpa [#allocation5 + $0x1], 1 }

// kernel: tpu_custom_call.1
= control target key start
LH: loop header
LB: loop body
LE: loop exit
PB: predicated region body
PF: predicated region fallthrough
CT: control target
= control target key end

     0   :  { %s2020_s0 = inlined_call_operand.vmem [shape: f32[2,8,32], index: 0, kind: input, shape index: {}]   ;;  %s2021_s1 = inlined_call_operand.vmem [shape: bf16[2,32,16], index: 1, kind: input, shape index: {}]   ;;  %s2022_s2 = inlined_call_operand.vmem [shape: f32[2,1,16], index: 2, kind: input, shape index: {}]   ;;  %s2023_s3 = inlined_call_operand.vmem [shape: bf16[2,32,16], index: 3, kind: input, shape index: {}]   ;;  %s2024_s4 = inlined_call_operand.vmem [shape: f32[2,1,16], index: 4, kind: input, shape index: {}]   ;;  %s2025_s5 = inlined_call_operand.vmem [shape: bf16[2,32,16], index: 5, kind: input, shape index: {}]   ;;  %s2026_s6 = inlined_call_operand.vmem [shape: f32[2,1,16], index: 6, kind: input, shape index: {}]   ;;  %s2027_s7 = inlined_call_operand.vmem [shape: bf16[2,16,32], index: 7, kind: input, shape index: {}]   ;;  %s2028_s8 = inlined_call_operand.vmem [shape: f32[1,32], index: 8, kind: input, shape index: {}]   ;;  %s2029_s9 = inlined_call_operand.vmem [shape: f32[1,32], index: 9, kind: input, shape index: {}]   ;;  %s2030_s10 = inlined_call_operand.vmem [shape: f32[1,32], index: 10, kind: input, shape index: {}]   ;;  %s2031_s11 = inlined_call_operand.vmem [shape: bf16[1,32,64], index: 11, kind: input, shape index: {}]   ;;  %s2032_s12 = inlined_call_operand.vmem [shape: f32[1,1,64], index: 12, kind: input, shape index: {}]   ;;  %s2033_s13 = inlined_call_operand.vmem [shape: bf16[1,64,32], index: 13, kind: input, shape index: {}]   ;;  %s2034_s14 = inlined_call_operand.vmem [shape: f32[1,32], index: 14, kind: input, shape index: {}]   ;;  %s2035_s15 = inlined_call_operand.vmem [shape: f32[1,32], index: 15, kind: input, shape index: {}]   ;;  %s2036_s16 = inlined_call_operand.vmem [shape: f32[1,32], index: 16, kind: input, shape index: {}]   ;;  %s2037_s17 = inlined_call_operand.hbm [shape: f32[2,8,32], index: 17, kind: output, shape index: {}]  }
   0x1   :  { %2043 = sst [smem:[#allocation12_spill]] %s2020_s0 }
   0x2   :  { %2044 = sst [smem:[#allocation13_spill]] %s2021_s1 }
   0x3   :  { %2045 = sst [smem:[#allocation14_spill]] %s2023_s3 }
   0x4   :  { %22 = vsyncpa [#allocation5], 0 }
   0x5   :  { %24 = vsyncpa [#allocation5 + $0x1], 0  ;;  %s1774_s24 = smov 0   ;;  %s1776_s25 = smov 0  }
   0x6   :  { %s1778_s26 = smov 0   ;;  %s1780_s27 = smov 0  }
   0x7   :  { %s1782_s28 = smov 0   ;;  %s1784_s29 = smov 0  }
   0x8 LB: > { %2046 = sst [smem:[#allocation7_spill]] %s1643_s24  ;;  %s1321_s0 = sadd.s32 4294967295, %s1663_s29   ;;  %s1663_s29 = sphi %s1784_s29, %s30_s29   ;;  %s1659_s28 = sphi %s1782_s28, %s2064_s28   ;;  %s1655_s27 = sphi %s1780_s27, %s2063_s27   ;;  %s1651_s26 = sphi %s1778_s26, %s2067_s26   ;;  %s1647_s25 = sphi %s1776_s25, %s2066_s25   ;;  %s1643_s24 = sphi %s1774_s24, %s2065_s24  }
   0x9   : > { %2047 = sst [smem:[#allocation8_spill]] %s1659_s28  ;;  %s1322_s30 = sadd.s32 4294967294, %s1663_s29  }
   0xa   : > { %s42_s18 = sadd.s32 1, %s1659_s28  ;;  %s413_s19 = sadd.s32 1, %s1651_s26 }
   0xb   : > { %p44_p0 = scmp.ge.s32.totalorder %s42_s18, 2  ;;  %p423_p1 = scmp.ne.s32.totalorder %s1651_s26, %s1647_s25 }
   0xc   : > { %p424_p2 = scmp.eq.s32.totalorder %s1321_s0, 1  ;;  %p429_p3 = scmp.ne.s32.totalorder %s1647_s25, %s1643_s24 }
   0xd   : > { %s2069_s18 = smov (%p44_p0, %s42_s18), 0  ;;  %p430_p5 = scmp.eq.s32.totalorder %s1322_s30, 1 }
   0xe   : > { %2048 = sst [smem:[#allocation9_spill]] %s2069_s18  ;;  %p1814_p4 = por %p424_p2, %p423_p1 }
   0xf   : > { %s408_s20 = ssub.s32 %s1659_s28, %s2069_s18  ;;  %p1325_p6 = scmp.ge.s32.totalorder %s1663_s29, 1 }
  0x10   : > { %p411_p7 = scmp.eq.s32.totalorder %s408_s20, 0  ;;  %p1821_p8 = por %p430_p5, %p429_p3 }
  0x11   : > { %p503_p9 = scmp.lt.s32.totalorder %s1663_s29, 3 }
  0x12   : > { %s2050_s21 = scalar_select %p1821_p8, 1, 0 }
  0x13   : > { %s1827_s22 = scalar_select %p411_p7, %s1651_s26, %s413_s19  }
  0x14   : > { %2051 = sst [smem:[#allocation10_spill]] %s2050_s21  ;;  %p504_p10 = pnand %p1325_p6, %p503_p9 }
  0x15   : > { %2052 = sst [smem:[#allocation11_spill]] %s1827_s22  ;;  %s2042_s23 = sand.u32 (!%p504_p10), 1, %s1647_s25  }
  0x16   : > { %507 = sbr.rel (%p504_p10) target bundleno = 2399 (0x95f), region = 88  ;;  %p554_p11 = scmp.lt.s32.totalorder (!%p504_p10), %s1655_s27, 1 }
  0x17   : > { %s1833_s0 = sshll.u32 (!%p504_p10), %s2042_s23, 3  ;;  %s2053_s21 = sld [smem:[#allocation12_spill]] (!%p504_p10) }
  0x18   : > { %s1843_s22 = smov (!%p504_p10), 0  }
  0x1d   : > { %s555_s30 = scalar_select %p554_p11, %s1655_s27, 1 }
  0x1f   : > { %s1327_s20 = sshll.u32 %s555_s30, 3 }
  0x20   : > { %s1839_s24 = scalar_lea.vmem %s2053_s21, %s1327_s20 }
  0x21   : > { %v563_v0 = vld [vmem:[%s1839_s24] sm:$0xff] }
  0x22   : > { %v564_v1 = vpack.c.bf16 %v563_v0, %v563_v0 }
  0x23 LB: >> { %v1677_v2 = vmov 0.0   ;;  %s1374_s30 = sshll.u32 %s1667_s22, 4  ;;  %vm1678_vm0 = vmmov 0   ;;  %s2054_s3 = sld [smem:[#allocation14_spill]]  ;;  %vm598_vm1 = vcmask 261120   ;;  %vm711_vm2 = vcmask 125952   ;;  %s1667_s22 = sphi %s1843_s22, %s570_s22  }
  0x24   : >> { %1401 = vmatprep.subr.bf16.mxu0 %v1677_v2  ;;  %1409 = vmatprep.subr.bf16.mxu1 %v1677_v2  ;;  %s643_s19 = scalar_lea.vmem %s2025_s5, %s1374_s30 }
  0x25   : >> { %1405 = vmatprep.mubr.msk.bf16.mxu0 %vm1678_vm0, %v1677_v2  ;;  %1413 = vmatprep.mubr.msk.bf16.mxu1 %vm1678_vm0, %v1677_v2  ;;  %v1549_v4 = vld [vmem:[%s643_s19] sm:$0xff]   ;;  %v1551_v6 = vld [vmem:[%s643_s19 + $0x8] sm:$0xff]  }
  0x26   : >> { %1410 = vmatpush3.bf16.msra.mxu1 %v1549_v4 }
  0x27   : >> { %1411 = vmatprep.subr.bf16.mxu1 %v1677_v2 }
  0x29   : >> { %s573_s21 = scalar_lea.vmem %s2054_s3, %s1374_s30  ;;  %s578_s30 = scalar_lea.vmem %s2024_s4, %s1667_s22 }
  0x2a   : >> { %v1548_v3 = vld [vmem:[%s573_s21] sm:$0xff]   ;;  %v1550_v5 = vld [vmem:[%s573_s21 + $0x8] sm:$0xff]   ;;  %1412 = vmatpush3.bf16.msra.mxu1 %v1551_v6  ;;  %s648_s3 = scalar_lea.vmem %s2026_s6, %s1667_s22  ;;  %s1339_s21 = sshll.u32 %s1667_s22, 2 }
  0x2b   : >> { %1402 = vmatpush3.bf16.msra.mxu0 %v1548_v3  ;;  %v1330_v7 = vld [vmem:[%s578_s30] ss:$0 sm:$0xff]  ;;  %s710_s19 = scalar_lea.vmem [#allocation2], %s1339_s21  ;;  %s715_s28 = scalar_lea.vmem [#allocation3], %s1339_s21 }
  0x2c   : >> { %1403 = vmatprep.subr.bf16.mxu0 %v1677_v2  ;;  %v1335_v8 = vld [vmem:[%s648_s3] ss:$0 sm:$0xff]  ;;  %s570_s22 = sadd.s32 1, %s1667_s22  }
  0x2d   : >> { %1414 = vmatmul.mubr.msk.bf16.vlgmr.msra.gmra.mrb[0].mxu1 %vm598_vm1, %v564_v1  ;;  %p567_p12 = scmp.ge.s32.totalorder %s570_s22, 2  }
  0x2e   : > { %v1870_v21 = vld [vmem:[%s1839_s24] sm:$0xff] (%p567_p12)  ;;  %v1874_v23 = vmov (%p567_p12), 0.0   ;;  %s1876_s3 = smov (%p567_p12), 0  }
  0x2f   : >> { %1404 = vmatpush3.bf16.msra.mxu0 %v1550_v5  ;;  %v720_v22 = vpack.c.bf16 (%p567_p12), %v1870_v21, %v1870_v21 }
  0x32   : >> { %1406 = vmatmul.mubr.msk.bf16.vlgmr.msra.gmra.mrb[0].mxu0 %vm598_vm1, %v564_v1 }
 0x100   : >> { %v702_v11 = vpop.f32.mrb[0].mxu1 }
 0x101   : >> { %v703_v13 = vadd.f32 %v1335_v8, %v702_v11  ;;  %v1415_v14 = vpop.f32.mrb[1].mxu1 }
 0x102   : >> { %v705_v17 = vpop.f32.mrb[2].mxu1 }
 0x103   : >> { %v713_v19 = vpack.c.bf16 %v703_v13, %v703_v13  ;;  %v1416_v20 = vpop.f32.mrb[3].mxu1 }
 0x104   : > { %569 = sbr.rel (!%p567_p12) target bundleno = 35 (0x23), region = 153 }
 0x105   : >> { %v636_v9 = vpop.f32.mrb[0].mxu0  ;;  %716 = vst.msk [vmem:[%s715_s28] sm:$0xf] %vm711_vm2, %v713_v19 }
 0x106   : >> { %v637_v10 = vadd.f32 %v1330_v7, %v636_v9  ;;  %v1407_v12 = vpop.f32.mrb[1].mxu0 }
 0x107   : >> { %v639_v15 = vpop.f32.mrb[2].mxu0 }
 0x108   : >> { %v708_v16 = vpack.c.bf16 %v637_v10, %v637_v10  ;;  %v1408_v18 = vpop.f32.mrb[3].mxu0 }
 0x10a   : >> { %712 = vst.msk [vmem:[%s710_s19] sm:$0xf] %vm711_vm2, %v708_v16 }
 0x10b LB: >> { %v1679_v24 = vmov 0.0   ;;  %vm1680_vm3 = vmmov 0   ;;  %s1376_s24 = sshll.u32 %s1675_s3, 4  ;;  %s2055_s30 = sld [smem:[#allocation13_spill]]  ;;  %vm808_vm4 = vcmask 130048   ;;  %vm855_vm5 = vcmask 64512   ;;  %s1675_s3 = sphi %s1876_s3, %s726_s3   ;;  %v1671_v23 = vphi %v1874_v23, %v2056_v23  }
 0x10c   : >> { %1417 = vmatprep.subr.bf16.mxu0 %v1679_v24  ;;  %1421 = vmatprep.mubr.msk.bf16.mxu0 %vm1680_vm3, %v1679_v24  ;;  %s1347_s20 = sshll.u32 %s1675_s3, 2  ;;  %vm874_vm6 = vcmask 1043456   ;;  %s1377_s23 = sshll.u32 %s1675_s3, 3 }
 0x10d   : >> { %1425 = vmatprep.subr.bf16.mxu1 %v1679_v24  ;;  %1427 = vmatprep.mubr.msk.bf16.mxu1 %vm1680_vm3, %v1679_v24  ;;  %s803_s21 = scalar_lea.vmem [#allocation2], %s1347_s20  ;;  %s806_s22 = scalar_lea.vmem [#allocation3], %s1347_s20 }
 0x10e   : >> { %v807_v42 = vld [vmem:[%s806_s22] sm:$0xf]  ;;  %s924_s20 = scalar_lea.vmem %s2027_s7, %s1377_s23 }
 0x10f   : >> { %v876_v43 = vsel %vm874_vm6, %v807_v42, 0  ;;  %v1554_v50 = vld [vmem:[%s924_s20] sm:$0xff]  }
 0x111   : >> { %s730_s18 = scalar_lea.vmem %s2055_s30, %s1376_s24  ;;  %v804_v27 = vld [vmem:[%s803_s21] sm:$0xf]  ;;  %s735_s24 = scalar_lea.vmem %s2022_s2, %s1675_s3 }
 0x112   : >> { %v1552_v25 = vld [vmem:[%s730_s18] sm:$0xff]   ;;  %v1553_v26 = vld [vmem:[%s730_s18 + $0x8] sm:$0xff]   ;;  %v813_v28 = vsel %vm808_vm4, %v804_v27, 0  ;;  %s726_s3 = sadd.s32 1, %s1675_s3  }
 0x113   : >> { %1418 = vmatpush3.bf16.msra.mxu0 %v1552_v25  ;;  %1426 = vmatpush3.bf16.xpose.msra.mxu1 %v813_v28  ;;  %v1343_v29 = vld [vmem:[%s735_s24] ss:$0 sm:$0xff]  ;;  %p723_p13 = scmp.ge.s32.totalorder %s726_s3, 2  }
 0x114   : >> { %1419 = vmatprep.subr.bf16.mxu0 %v1679_v24  ;;  %1437 = vmatprep.subr.bf16.mxu1 %v1679_v24  ;;  %v1355_v6 = vld [vmem:[%s2028_s8] ss:$0 sm:$0xff] (%p723_p13)  ;;  %v1681_v16 = vmov (%p723_p13), 0.0   ;;  %vm1682_vm7 = vmmov (%p723_p13), 0   ;;  %v1562_v17 = vld [vmem:[%s2031_s11 + $0x8] sm:$0xff] (%p723_p13)   ;;  %vm1129_vm8 = vcmask (%p723_p13), 523264  }
 0x115   : > { %v1561_v15 = vld [vmem:[%s2031_s11] sm:$0xff] (%p723_p13)   ;;  %s1371_s23 = sshll.u32 (%p723_p13), %s1655_s27, 7  ;;  %s2057_s30 = scalar_lea.vmem (%p723_p13), [#allocation4], %s1833_s0 }
 0x116   : > { %v1563_v28 = vld [vmem:[%s2033_s13] sm:$0xff] (%p723_p13)   ;;  %s1219_s18 = sshll.u32 (%p723_p13), %s2057_s30, 4  ;;  %s1968_s19 = scalar_lea.hbm (%p723_p13), %s2037_s17, %s1371_s23  ;;  %s1970_s18 = int_to_ptr.vmem [resolvable:$true] %s1219_s18 }
 0x117   : >> { %1420 = vmatpush3.bf16.msra.mxu0 %v1553_v26  ;;  %s2058_s28 = smov (%p723_p13), %s2057_s30  ;;  %s2059_s3 = sand.u32 (%p723_p13), 1, %s1647_s25  }
 0x118   : >> { %1431 = vmatprep.subr.bf16.mxu0 %v1679_v24  ;;  %s1205_s24 = scalar_lea.sflag (%p723_p13), [#allocation5], %s2059_s3  ;;  %s1573_s27 = scalar_lea.vmem (%p723_p13), %s1970_s18, 128 }
 0x119   : > { %p1574_p0 = scmp.ne.s32.totalorder (%p723_p13), %s1970_s18, %s1573_s27  ;;  %s1683_s22 = smov (%p723_p13), [#allocation4]  }
 0x11a   : >> { %1422 = vmatmul.mubr.msk.bf16.vlgmr.msra.gmra.mrb[0].mxu0 %vm598_vm1, %v720_v22  ;;  %v1356_v22 = vld [vmem:[%s2029_s9] ss:$0 sm:$0xff] (%p723_p13)  ;;  %s1577_s30 = sshll.u32 (%p723_p13), %s1683_s22, 4  ;;  %s1578_s30 = int_to_ptr.vmem [resolvable:$false] %s1577_s30 }
 0x11b   : >> { %1433 = vmatprep.mubr.msk.bf16.mxu0 %vm1680_vm3, %v1679_v24  ;;  %1432 = vmatpush3.bf16.msra.mxu0 %v876_v43  ;;  %p1575_p1 = pnand (%p723_p13), %p1574_p0, %p1814_p4  ;;  %s1579_s23 = scalar_lea.vmem (%p723_p13), %s1578_s30, 256 }
 0x11c   : > { %1443 = vmatprep.subr.bf16.mxu0 (%p723_p13), %v1681_v16  ;;  %p1580_p3 = scmp.lt.s32.totalorder (%p723_p13), %s1970_s18, %s1578_s30  ;;  %p1581_p5 = scmp.lt.s32.totalorder (%p723_p13), %s1579_s23, %s1573_s27 }
 0x11d   : > { %p1576_p2 = pneg (%p723_p13), %p1575_p1 }
 0x11e   : > { %p1582_p6 = por (%p723_p13), %p1581_p5, %p1580_p3 }
 0x120   : > { %p1583_p7 = pnand (%p723_p13), %p1582_p6, %p1576_p2 }
 0x1ed   : >> { %v793_v30 = vpop.f32.mrb[0].mxu0 }
 0x1ee   : >> { %v794_v31 = vadd.f32 %v1343_v29, %v793_v30  ;;  %v1423_v32 = vpop.f32.mrb[1].mxu0  ;;  %v1564_v29 = vld [vmem:[%s2033_s13 + $0x8] sm:$0xff] (%p723_p13)   ;;  %v1565_v30 = vld [vmem:[%s2033_s13 + $0x10] sm:$0xff] (%p723_p13)  }
 0x1ef   : >> { %v796_v33 = vpop.f32.mrb[2].mxu0  ;;  %v1358_v32 = vld [vmem:[%s2032_s12] ss:$0 sm:$0xff] (%p723_p13) }
 0x1f0   : >> { %v799_v34 = vmul.f32 0.25, %v794_v31  ;;  %v1424_v35 = vpop.f32.mrb[3].mxu0  ;;  %v1566_v31 = vld [vmem:[%s2033_s13 + $0x18] sm:$0xff] (%p723_p13)  }
 0x1f2   : >> { %v800_v36 = vpack.c.bf16 %v799_v34, %v799_v34 }
 0x1f4   : >> { %1428 = vmatmul.mubr.msk.bf16.vlgmr.msra.gmra.mrb[0].mxu1 %vm808_vm4, %v800_v36 }
 0x1f5   : >> { %1439 = vmatprep.mubr.msk.bf16.mxu1 %vm1680_vm3, %v1679_v24  ;;  %1438 = vmatpush3.bf16.msra.mxu1 %v1554_v50  ;;  %v1357_v24 = vld [vmem:[%s2030_s10] ss:$0 sm:$0xff] (%p723_p13) }
 0x1f6   : > { %1451 = vmatprep.subr.bf16.mxu1 (%p723_p13), %v1681_v16 }
 0x2c7   : >> { %v849_v37 = vpop.f32.mrb[0].mxu1 }
 0x2c8   : >> { %v1429_v38 = vpop.f32.mrb[1].mxu1  ;;  %v856_v39 = vsel %vm855_vm5, %v849_v37, -inf }
 0x2c9   : >> { %857 = vmax.xlane.f32.xlu0 %v856_v39  ;;  %v852_v40 = vpop.f32.mrb[2].mxu1 }
 0x2ca   : >> { %v1430_v41 = vpop.f32.mrb[3].mxu1 }
 0x356   : >> { %v858_v44 = vpop.xlane.xlu0 %857 }
 0x357   : >> { %v862_v45 = vsub.f32 %v849_v37, %v858_v44  ;;  %v859_v51 = vsub.f32 -inf, %v858_v44  ;;  %v1362_v44 = vld [vmem:[%s2034_s14] ss:$0 sm:$0xff] (%p723_p13) }
 0x359   : >> { %v863_v46 = vmul.f32 1.442695, %v862_v45  ;;  %v860_v52 = vmul.f32 1.442695, %v859_v51 }
 0x35b   : >> { %1555 = vpow2.f32 %v863_v46 }
 0x35c   : >> { %1557 = vpow2.f32 %v860_v52 }
 0x365   : >> { %v1556_v47 = vpop.eup %1555 }
 0x366   : >> { %v866_v48 = vsel %vm855_vm5, %v1556_v47, 0.0  ;;  %v870_v49 = vpack.c.bf16 %v1556_v47, %v1556_v47  ;;  %v1558_v53 = vpop.eup %1557 }
 0x367   : >> { %867 = vadd.xlane.f32.xlu0 %v866_v48  ;;  %v865_v55 = vmul.f32 0.0, %v1558_v53 }
 0x368   : >> { %1434 = vmatmul.mubr.msk.bf16.vlgmr.msra.gmra.mrb[4].mxu0 %vm855_vm5, %v870_v49 }
 0x369   : > { %1447 = vmatprep.mubr.msk.bf16.mxu0 (%p723_p13), %vm1682_vm7, %v1681_v16  ;;  %1444 = vmatpush3.bf16.msra.mxu0 (%p723_p13), %v1561_v15 }
 0x36a   : > { %1445 = vmatprep.subr.bf16.mxu0 (%p723_p13), %v1681_v16 }
 0x36d   : > { %1446 = vmatpush3.bf16.msra.mxu0 (%p723_p13), %v1562_v17 }
 0x3f4   : >> { %v868_v54 = vpop.xlane.xlu0 %867 }
 0x3f5   : >> { %v869_v56 = vadd.f32 %v868_v54, %v865_v55 }
 0x3f7   : >> { %1559 = vrcp.f32 %v869_v56 }
 0x401   : >> { %v1560_v60 = vpop.eup %1559 }
 0x43b   : >> { %v912_v57 = vpop.f32.mrb[4].mxu0 }
 0x43c   : >> { %v918_v58 = vadd.f32 %v912_v57, %v865_v55  ;;  %v1435_v59 = vpop.f32.mrb[5].mxu0 }
 0x43d   : >> { %v915_v61 = vpop.f32.mrb[6].mxu0 }
 0x43e   : >> { %v920_v62 = vmul.f32 %v1560_v60, %v918_v58  ;;  %v1436_v63 = vpop.f32.mrb[7].mxu0  ;;  %v1368_v61 = vld [vmem:[%s2035_s15] ss:$0 sm:$0xff] (%p723_p13) }
 0x43f   : > { %v1369_v63 = vld [vmem:[%s2036_s16] ss:$0 sm:$0xff] (%p723_p13) }
 0x440   : >> { %v921_v0 = vpack.c.bf16 %v920_v62, %v920_v62 }
 0x442   : >> { %1440 = vmatmul.mubr.msk.bf16.vlgmr.msra.gmra.mrb[4].mxu1 %vm808_vm4, %v921_v0 }
 0x443   : > { %1459 = vmatprep.mubr.msk.bf16.mxu1 (%p723_p13), %vm1682_vm7, %v1681_v16  ;;  %1452 = vmatpush3.bf16.msra.mxu1 (%p723_p13), %v1563_v28 }
 0x444   : > { %1453 = vmatprep.subr.bf16.mxu1 (%p723_p13), %v1681_v16 }
 0x447   : > { %1454 = vmatpush3.bf16.msra.mxu1 (%p723_p13), %v1564_v29 }
 0x448   : > { %1455 = vmatprep.subr.bf16.mxu1 (%p723_p13), %v1681_v16 }
 0x44b   : > { %1456 = vmatpush3.bf16.msra.mxu1 (%p723_p13), %v1565_v30 }
 0x44c   : > { %1457 = vmatprep.subr.bf16.mxu1 (%p723_p13), %v1681_v16 }
 0x44f   : > { %1458 = vmatpush3.bf16.msra.mxu1 (%p723_p13), %v1566_v31 }
 0x512   : > { %725 = sbr.rel (!%p723_p13) target bundleno = 267 (0x10b), region = 164 }
 0x515   : >> { %v970_v1 = vpop.f32.mrb[4].mxu1 }
 0x516   : >> { %v976_v2 = vadd.f32 %v1671_v23, %v970_v1   ;;  %v1441_v3 = vpop.f32.mrb[5].mxu1 }
 0x517   : >> { %v973_v4 = vpop.f32.mrb[6].mxu1 }
 0x518   : >> { %v1442_v5 = vpop.f32.mrb[7].mxu1  ;;  %v2056_v23 = vmov %v976_v2  ;;  %v984_v7 = vadd.f32 (%p723_p13), %v1355_v6, %v976_v2 }
 0x51a   : > { %v985_v8 = vadd.f32 %v984_v7, %v1870_v21 }
 0x51c   : > { %v989_v9 = vsel %vm598_vm1, %v985_v8, 0.0 }
 0x51d   : > { %990 = vadd.xlane.f32.xlu0 %v989_v9 }
 0x5aa   : > { %v991_v10 = vpop.xlane.xlu0 %990 }
 0x5ab   : > { %v993_v11 = vmul.f32 0.03125, %v991_v10 }
 0x5ad   : > { %v994_v12 = vsub.f32 %v985_v8, %v993_v11 }
 0x5af   : > { %v995_v13 = vmul.f32 %v994_v12, %v994_v12 }
 0x5b1   : > { %v996_v14 = vsel %vm598_vm1, %v995_v13, 0.0 }
 0x5b2   : > { %997 = vadd.xlane.f32.xlu0 %v996_v14 }
 0x63f   : > { %v998_v18 = vpop.xlane.xlu0 %997 }
 0x640   : > { %v999_v19 = vmul.f32 0.03125, %v998_v18 }
 0x642   : > { %v1000_v20 = vadd.f32 1e-12, %v999_v19 }
 0x644   : > { %1567 = vrsqrt.f32 %v1000_v20 }
 0x64e   : > { %v1568_v21 = vpop.eup %1567 }
 0x64f   : > { %v1002_v23 = vmul.f32 %v1568_v21, %v994_v12 }
 0x651   : > { %v1009_v25 = vmul.f32 %v1356_v22, %v1002_v23 }
 0x653   : > { %v1016_v26 = vadd.f32 %v1357_v24, %v1009_v25 }
 0x655   : > { %v1017_v27 = vpack.c.bf16 %v1016_v26, %v1016_v26 }
 0x657   : > { %1448 = vmatmul.mubr.msk.bf16.vlgmr.msra.gmra.mrb[0].mxu0 %vm598_vm1, %v1017_v27 }
 0x72a   : > { %v1078_v33 = vpop.f32.mrb[0].mxu0 }
 0x72b   : > { %v1079_v34 = vadd.f32 %v1358_v32, %v1078_v33  ;;  %v1449_v35 = vpop.f32.mrb[1].mxu0 }
 0x72c   : > { %v1081_v36 = vpop.f32.mrb[2].mxu0 }
 0x72d   : > { %v1085_v37 = vmul.f32 0.70710677, %v1079_v34  ;;  %v1450_v38 = vpop.f32.mrb[3].mxu0  ;;  %v1084_v40 = vmul.f32 0.5, %v1079_v34 }
 0x72f   : > { %1569 = verf.f32 %v1085_v37 }
 0x739   : > { %v1570_v39 = vpop.eup %1569 }
 0x73a   : > { %v1087_v41 = vadd.f32 1.0, %v1570_v39 }
 0x73c   : > { %v1088_v42 = vmul.f32 %v1087_v41, %v1084_v40 }
 0x73e   : > { %v1089_v43 = vpack.c.bf16 %v1088_v42, %v1088_v42 }
 0x740   : > { %1460 = vmatmul.mubr.msk.bf16.vlgmr.msra.gmra.mrb[0].mxu1 %vm1129_vm8, %v1089_v43 }
 0x813   : > { %v1167_v45 = vpop.f32.mrb[0].mxu1 }
 0x814   : > { %v1168_v46 = vadd.f32 %v1362_v44, %v1167_v45  ;;  %v1461_v47 = vpop.f32.mrb[1].mxu1 }
 0x815   : > { %v1170_v48 = vpop.f32.mrb[2].mxu1 }
 0x816   : > { %v1462_v49 = vpop.f32.mrb[3].mxu1  ;;  %v1173_v50 = vadd.f32 %v1168_v46, %v1016_v26 }
 0x818   : > { %v1176_v51 = vsel %vm598_vm1, %v1173_v50, 0.0 }
 0x819   : > { %1177 = vadd.xlane.f32.xlu1 %v1176_v51 }
 0x8a6   : > { %v1178_v52 = vpop.xlane.xlu1 %1177 }
 0x8a7   : > { %v1179_v53 = vmul.f32 0.03125, %v1178_v52 }
 0x8a9   : > { %v1180_v54 = vsub.f32 %v1173_v50, %v1179_v53 }
 0x8ab   : > { %v1181_v55 = vmul.f32 %v1180_v54, %v1180_v54 }
 0x8ad   : > { %v1182_v56 = vsel %vm598_vm1, %v1181_v55, 0.0 }
 0x8ae   : > { %1183 = vadd.xlane.f32.xlu1 %v1182_v56 }
 0x93b   : > { %v1184_v57 = vpop.xlane.xlu1 %1183 }
 0x93c   : > { %v1185_v58 = vmul.f32 0.03125, %v1184_v57 }
 0x93e   : > { %v1186_v59 = vadd.f32 1e-12, %v1185_v58 }
 0x940   : > { %1571 = vrsqrt.f32 %v1186_v59 }
 0x94a   : > { %v1572_v60 = vpop.eup %1571 }
 0x94b   : > { %v1188_v62 = vmul.f32 %v1572_v60, %v1180_v54 }
 0x94d   : > { %v1195_v0 = vmul.f32 %v1368_v61, %v1188_v62 }
 0x94f   : > { %v1202_v1 = vadd.f32 %v1369_v63, %v1195_v0 }
 0x951   : > { %1203 = vst.msk [vmem:[%s2058_s28] sm:$0xff] %vm598_vm1, %v1202_v1 }
 0x952   : > { %1586 = shalt.err (!%p1583_p7)
}
 0x953   : > { %s1587_s0 = scalar_lea.hbm %s1968_s19, 128  ;;  %s1591_s28 = scalar_lea.hbm %s2037_s17, 256 }
 0x954   : > { %p1588_p9 = scmp.ne.s32.totalorder %s1968_s19, %s1587_s0  ;;  %p1592_p12 = scmp.lt.u32.totalorder %s1968_s19, %s2037_s17 }
 0x955   : > { %p1593_p13 = scmp.lt.u32.totalorder %s1591_s28, %s1587_s0  ;;  %p1595_p1 = scmp.lt.u32.totalorder %s1587_s0, %s1968_s19 }
 0x956   : > { %p1589_p10 = pnand %p1588_p9, %p1814_p4 }
 0x957   : > { %p1594_p0 = por %p1593_p13, %p1592_p12 }
 0x958   : > { %p1590_p11 = pneg %p1589_p10 }
 0x959   : > { %p1596_p2 = por %p1595_p1, %p1594_p0 }
 0x95b   : > { %p1597_p3 = pnand %p1596_p2, %p1590_p11 }
 0x95d   : > { %1600 = shalt.err (!%p1597_p3)
}
 0x95e   : > { %1463 = dma.vmem_to_hbm [thread:$0]  (%p1814_p4), %s1970_s18, 128, %s1968_s19, %s1205_s24  }
 0x95f PF: > { %s2060_s27 = sld [smem:[#allocation7_spill]]  ;;  %p1469_p5 = scmp.ge.s32.totalorder %s1663_s29, 2 }
 0x961   : > { %p1466_p6 = pnand %p1469_p5, %p1821_p8 }
 0x965   : > { %s1231_s23 = sand.u32 1, %s2060_s27  }
 0x966   : > { %s1232_s20 = scalar_lea.sflag [#allocation5], %s1231_s23 }
 0x967   : > { %1638 = dma.done.wait (!%p1466_p6), %s1232_s20, 128  }
 0x968   : > { %1640 = vsyncadd (!%p1466_p6), %s1232_s20, 4294967168  ;;  %s30_s29 = sadd.s32 1, %s1663_s29   ;;  %s2062_s1 = sld [smem:[#allocation11_spill]] }
 0x969   : > { %p27_p7 = scmp.ge.s32.totalorder %s30_s29, 4   ;;  %s2063_s27 = sld [smem:[#allocation8_spill]] }
 0x96a   : > { %s2064_s28 = sld [smem:[#allocation9_spill]]  ;;  %s2065_s24 = smov %s1647_s25 }
 0x96b   : > { %s2066_s25 = smov %s1651_s26  ;;  %29 = sbr.rel (!%p27_p7) target bundleno = 8 (0x8), region = 175 }
 0x96e   : > { %s2067_s26 = smov %s2062_s1 }
 0x972   :  { %1237 = vsyncpa [#allocation5], 1 }
 0x973   :  { %1239 = vsyncpa [#allocation5 + $0x1], 1 }

</bundles_post_ra>
